<compile_context>
chip_gen: v7x
topology: tpu7x:2x2x1
jax: 0.10.0
libtpu: 0.0.40
codegen_flags: <defaults>
</compile_context>

<pallas_src>
import math
import functools

import jax
import jax.numpy as jnp
from jax import lax
from jax.experimental import pallas as pl
from jax.experimental.pallas import tpu as pltpu


def _layer_norm(x, gamma, beta, eps=1e-6):
    # PyTorch nn.LayerNorm over the last dim (biased variance), eps=1e-6.
    mu = jnp.mean(x, axis=-1, keepdims=True)
    var = jnp.mean((x - mu) ** 2, axis=-1, keepdims=True)
    return (x - mu) * lax.rsqrt(var + eps) * gamma + beta


def mha_kernel(q_ref, k_ref, v_ref,
               wq_ref, wk_ref, wv_ref, wfc_ref,
               gamma_ref, beta_ref,
               out_ref, *rest,
               n_head, d_k, d_v, share_ln, matmul_dtype, has_attn):
    # rest = (attn_ref?, kproj_scratch, vproj_scratch)
    if has_attn:
        attn_ref, kproj_ref, vproj_ref = rest
    else:
        attn_ref = None
        kproj_ref, vproj_ref = rest

    gamma = gamma_ref[...]      # (1, d_model)
    beta = beta_ref[...]        # (1, d_model)

    residual = q_ref[0]                               # (tq, d_model) f32
    qn = _layer_norm(residual, gamma, beta)

    # ---- Per-batch K/V path (layernorm + projections), computed once per batch
    # and carried across the q-tile axis in VMEM scratch. ----
    @pl.when(pl.program_id(1) == 0)
    def _():
        if share_ln:
            # Self-attention with a single q tile: q, k, v alias the same tensor.
            kn = qn
            vn = qn
        else:
            kn = _layer_norm(k_ref[0], gamma, beta)   # (len_k, d_model)
            vn = _layer_norm(v_ref[0], gamma, beta)   # (len_k, d_model)
        kproj_ref[...] = jnp.dot(
            kn.astype(matmul_dtype), wk_ref[...],
            preferred_element_type=jnp.float32).astype(kproj_ref.dtype)
        vproj_ref[...] = jnp.dot(
            vn.astype(matmul_dtype), wv_ref[...],
            preferred_element_type=jnp.float32).astype(vproj_ref.dtype)

    # Q projection (1/sqrt(d_k) already folded into wq_ref host-side).
    q_all = jnp.dot(qn.astype(matmul_dtype), wq_ref[...],
                    preferred_element_type=jnp.float32).astype(matmul_dtype)
    k_all = kproj_ref[...]       # (len_k, n_head*d_k) matmul_dtype
    v_all = vproj_ref[...]       # (len_k, n_head*d_v) matmul_dtype

    ctx_heads = []
    for h in range(n_head):      # static unroll over heads
        q_h = q_all[:, h * d_k:(h + 1) * d_k]     # (tq,    d_k)
        k_h = k_all[:, h * d_k:(h + 1) * d_k]     # (len_k, d_k)
        v_h = v_all[:, h * d_v:(h + 1) * d_v]     # (len_k, d_v)

        # scores = q_h @ k_h.T without materializing a transpose of k_h.
        s = lax.dot_general(q_h, k_h, (((1,), (1,)), ((), ())),
                            preferred_element_type=jnp.float32)  # (tq, len_k)

        # Numerically stable softmax pieces (f32); denom reciprocal on the EUP
        # plus one Newton step (~f32 exact).
        s = s - jnp.max(s, axis=-1, keepdims=True)
        e = jnp.exp(s)
        denom = jnp.sum(e, axis=-1, keepdims=True)
        inv = pl.reciprocal(denom, approx=True)
        inv = inv * (2.0 - denom * inv)

        if attn_ref is not None:
            attn = e * inv                                       # (tq, len_k)
            attn_ref[0, h, :, :] = attn
            ctx_h = jnp.dot(attn.astype(matmul_dtype), v_h,
                            preferred_element_type=jnp.float32)  # (tq, d_v)
        else:
            # Deferred normalization: scale the (tq, d_v) context instead of
            # the (tq, len_k) exponentials.
            ctx_h = jnp.dot(e.astype(matmul_dtype), v_h,
                            preferred_element_type=jnp.float32) * inv
        ctx_heads.append(ctx_h.astype(matmul_dtype))

    # Fused output projection: one (tq, H*d_v) x (H*d_v, d_model) matmul.
    ctx = jnp.concatenate(ctx_heads, axis=-1)                    # (tq, H*d_v)
    o = jnp.dot(ctx, wfc_ref[...], preferred_element_type=jnp.float32)
    o = o + residual
    out_ref[0] = _layer_norm(o, gamma, beta).astype(out_ref.dtype)


# ----------------------------- sizing helpers ------------------------------
def _device_vmem_bytes():
    # v5e/v6e: 128 MiB; v7x: 64 MiB per TensorCore.  Query when possible.
    try:
        return int(pltpu.get_tpu_info().vmem_capacity_bytes)
    except Exception:
        return 64 << 20   # conservative fallback (v7x per-core VMEM)


def _resident_vmem_bytes(tq, len_k, d_model, n_head, d_k, d_v,
                         matmul_bytes, with_attn):
    f32 = 4
    db = 2  # pipelined operands are double-buffered by default
    q_and_out = db * 2 * tq * d_model * f32
    kv_in = db * 2 * len_k * d_model * f32
    weights = db * (2 * d_model * n_head * d_k
                    + 2 * n_head * d_v * d_model) * matmul_bytes
    ln_params = db * 2 * d_model * f32
    kv_proj_scratch = len_k * n_head * (d_k + d_v) * matmul_bytes  # single buffer
    attn_out = db * n_head * tq * len_k * f32 if with_attn else 0
    return q_and_out + kv_in + weights + ln_params + kv_proj_scratch + attn_out


def _vmem_limit_bytes(resident_bytes, device_vmem):
    est = resident_bytes + (8 << 20)            # headroom for compiler scratch
    lo = 16 << 20
    hi = max(lo, device_vmem - (8 << 20))
    return int(min(max(est, lo), hi))


def _pick_q_tile(len_q, estimate_fn, budget):
    # Largest q-row tile (up to 512, or the full sequence when short) whose
    # resident footprint fits the device VMEM budget and divides len_q.
    cands = []
    if len_q <= 512:
        cands.append(len_q)
    for t in (512, 256, 128, 64, 32, 16, 8):
        if t < len_q and len_q % t == 0:
            cands.append(t)
    if not cands:
        return len_q
    for t in cands:
        if estimate_fn(t) <= budget:
            return t
    return cands[-1]


# --------------------------------- wrapper ----------------------------------
def multi_head_attention(q, k, v, params, *, n_head, d_k, d_v,
                         matmul_dtype=jnp.bfloat16, return_attn=False,
                         q_tile=None):
    B, len_q, d_model = q.shape
    len_k = k.shape[1]
    matmul_bytes = jnp.dtype(matmul_dtype).itemsize

    device_vmem = _device_vmem_bytes()
    est = lambda t: _resident_vmem_bytes(t, len_k, d_model, n_head, d_k, d_v,
                                         matmul_bytes, return_attn)
    if q_tile is None:
        tq = _pick_q_tile(len_q, est, (device_vmem * 3) // 4)
    else:
        assert len_q % q_tile == 0
        tq = q_tile
    n_q_tiles = len_q // tq

    # Pre-transpose nn.Linear weights (out, in) -> (in, out), fold 1/sqrt(d_k)
    # into Wq, and pre-cast everything to the MXU operand dtype host-side.
    scale = jnp.float32(1.0 / math.sqrt(d_k))
    wq_t = (params["w_qs"].T * scale).astype(matmul_dtype)  # (d_model, H*d_k)
    wk_t = params["w_ks"].T.astype(matmul_dtype)             # (d_model, H*d_k)
    wv_t = params["w_vs"].T.astype(matmul_dtype)             # (d_model, H*d_v)
    wfc_t = params["fc"].T.astype(matmul_dtype)              # (H*d_v, d_model)
    gamma = params["ln_gamma"].reshape(1, d_model).astype(jnp.float32)
    beta = params["ln_beta"].reshape(1, d_model).astype(jnp.float32)

    # Self-attention fast path (perf-only; under jit distinct tracers fall back).
    share_ln = (q is k) and (k is v) and (n_q_tiles == 1)

    kernel = functools.partial(
        mha_kernel, n_head=n_head, d_k=d_k, d_v=d_v,
        share_ln=share_ln, matmul_dtype=matmul_dtype, has_attn=return_attn)

    out_shape = [jax.ShapeDtypeStruct((B, len_q, d_model), jnp.float32)]
    out_specs = [pl.BlockSpec((1, tq, d_model), lambda b, i: (b, i, 0))]
    if return_attn:
        # NOTE: costs O(B*H*S^2) HBM writeback + the dominant VMEM tile; keep
        # return_attn=False (default) when the caller only needs `out`.
        out_shape.append(jax.ShapeDtypeStruct((B, n_head, len_q, len_k),
                                              jnp.float32))
        out_specs.append(pl.BlockSpec((1, n_head, tq, len_k),
                                      lambda b, i: (b, 0, i, 0)))

    results = pl.pallas_call(
        kernel,
        out_shape=tuple(out_shape),
        grid=(B, n_q_tiles),
        in_specs=[
            pl.BlockSpec((1, tq, d_model), lambda b, i: (b, i, 0)),
            pl.BlockSpec((1, len_k, d_model), lambda b, i: (b, 0, 0)),
            pl.BlockSpec((1, len_k, d_model), lambda b, i: (b, 0, 0)),
            pl.BlockSpec((d_model, n_head * d_k), lambda b, i: (0, 0)),
            pl.BlockSpec((d_model, n_head * d_k), lambda b, i: (0, 0)),
            pl.BlockSpec((d_model, n_head * d_v), lambda b, i: (0, 0)),
            pl.BlockSpec((n_head * d_v, d_model), lambda b, i: (0, 0)),
            pl.BlockSpec((1, d_model), lambda b, i: (0, 0)),
            pl.BlockSpec((1, d_model), lambda b, i: (0, 0)),
        ],
        out_specs=tuple(out_specs),
        scratch_shapes=[
            pltpu.VMEM((len_k, n_head * d_k), matmul_dtype),   # projected K
            pltpu.VMEM((len_k, n_head * d_v), matmul_dtype),   # projected V
        ],
        compiler_params=pltpu.CompilerParams(
            # q-tile axis carries the per-batch K/V scratch -> "arbitrary".
            dimension_semantics=("parallel", "arbitrary"),
            vmem_limit_bytes=_vmem_limit_bytes(est(tq), device_vmem),
        ),
    )(q, k, v, wq_t, wk_t, wv_t, wfc_t, gamma, beta)

    if return_attn:
        out, attn = results
        return out, attn
    (out,) = results
    return out


# -------- pure-JAX reference (mirrors the PyTorch forward, eval mode) --------
def _reference(q, k, v, params, *, n_head, d_k, d_v):
    B, len_q, d_model = q.shape
    len_k = k.shape[1]
    g, b = params["ln_gamma"], params["ln_beta"]
    ln = lambda x: _layer_norm(x, g, b)
    residual = q
    qn, kn, vn = ln(q), ln(k), ln(v)
    Q = (qn @ params["w_qs"].T).reshape(B, len_q, n_head, d_k).transpose(0, 2, 1, 3)
    K = (kn @ params["w_ks"].T).reshape(B, len_k, n_head, d_k).transpose(0, 2, 1, 3)
    V = (vn @ params["w_vs"].T).reshape(B, len_k, n_head, d_v).transpose(0, 2, 1, 3)
    s = jnp.einsum("bhqd,bhkd->bhqk", Q / math.sqrt(d_k), K)
    attn = jax.nn.softmax(s, axis=-1)
    o = jnp.einsum("bhqk,bhkd->bhqd", attn, V)
    o = o.transpose(0, 2, 1, 3).reshape(B, len_q, n_head * d_v)
    o = o @ params["fc"].T
    o = o + residual
    return ln(o), attn


def _make_params(key, d_model, n_head, d_k, d_v):
    k_wq, k_wk, k_wv, k_fc, k_g, k_b = jax.random.split(key, 6)
    return {
        "w_qs": 0.1 * jax.random.normal(k_wq, (n_head * d_k, d_model), jnp.float32),
        "w_ks": 0.1 * jax.random.normal(k_wk, (n_head * d_k, d_model), jnp.float32),
        "w_vs": 0.1 * jax.random.normal(k_wv, (n_head * d_v, d_model), jnp.float32),
        "fc":   0.1 * jax.random.normal(k_fc, (d_model, n_head * d_v), jnp.float32),
        "ln_gamma": 1.0 + 0.1 * jax.random.normal(k_g, (d_model,), jnp.float32),
        "ln_beta":  0.1 * jax.random.normal(k_b, (d_model,), jnp.float32),
    }


if __name__ == "__main__":
    key = jax.random.PRNGKey(0)
    k_data, k_par, k_data2, k_par2 = jax.random.split(key, 4)

    # ---- small shapes consistent with the module ----
    B, S, d_model = 2, 8, 32
    n_head, d_k, d_v = 2, 16, 16
    k_q, k_k, k_v = jax.random.split(k_data, 3)
    q = jax.random.normal(k_q, (B, S, d_model), jnp.float32)
    k = jax.random.normal(k_k, (B, S, d_model), jnp.float32)
    v = jax.random.normal(k_v, (B, S, d_model), jnp.float32)
    params = _make_params(k_par, d_model, n_head, d_k, d_v)

    ref_out, ref_attn = _reference(q, k, v, params, n_head=n_head, d_k=d_k, d_v=d_v)

    # 1) f32 matmul path with the attention matrix (matches module numerics).
    out, attn = multi_head_attention(q, k, v, params, n_head=n_head, d_k=d_k,
                                     d_v=d_v, matmul_dtype=jnp.float32,
                                     return_attn=True)
    out = jax.block_until_ready(out)
    attn = jax.block_until_ready(attn)
    assert out.shape == (B, S, d_model) and attn.shape == (B, n_head, S, S)
    assert jnp.allclose(out, ref_out, atol=1e-4, rtol=1e-4)
    assert jnp.allclose(attn, ref_attn, atol=1e-4, rtol=1e-4)

    # 2) default fast path: bf16 MXU operands, out-only, deferred normalization.
    out_fast = jax.block_until_ready(
        multi_head_attention(q, k, v, params, n_head=n_head, d_k=d_k, d_v=d_v))
    assert jnp.allclose(out_fast, ref_out, atol=5e-2, rtol=5e-2)

    # 3) self-attention path (shared layernorm), f32, out-only.
    ref_self, _ = _reference(q, q, q, params, n_head=n_head, d_k=d_k, d_v=d_v)
    out_self = jax.block_until_ready(
        multi_head_attention(q, q, q, params, n_head=n_head, d_k=d_k, d_v=d_v,
                             matmul_dtype=jnp.float32))
    assert jnp.allclose(out_self, ref_self, atol=1e-4, rtol=1e-4)

    # 4) multi-q-tile path: exercises the per-batch K/V hoist (pl.when carry
    #    across the "arbitrary" q-tile axis).
    B2, S2, dm2 = 2, 32, 64
    nh2, dk2, dv2 = 4, 16, 16
    k_q2, k_k2, k_v2 = jax.random.split(k_data2, 3)
    q2 = jax.random.normal(k_q2, (B2, S2, dm2), jnp.float32)
    k2 = jax.random.normal(k_k2, (B2, S2, dm2), jnp.float32)
    v2 = jax.random.normal(k_v2, (B2, S2, dm2), jnp.float32)
    params2 = _make_params(k_par2, dm2, nh2, dk2, dv2)
    ref2_out, ref2_attn = _reference(q2, k2, v2, params2, n_head=nh2, d_k=dk2, d_v=dv2)
    out2, attn2 = multi_head_attention(q2, k2, v2, params2, n_head=nh2, d_k=dk2,
                                       d_v=dv2, matmul_dtype=jnp.float32,
                                       return_attn=True, q_tile=8)
    out2 = jax.block_until_ready(out2)
    attn2 = jax.block_until_ready(attn2)
    assert jnp.allclose(out2, ref2_out, atol=1e-4, rtol=1e-4)
    assert jnp.allclose(attn2, ref2_attn, atol=1e-4, rtol=1e-4)

    print("KERNEL_OK")
</pallas_src>

<mosaic_0001>
module attributes {stable_mosaic.version = 11 : i64} {
  func.func @mha_kernel(%arg0: i32, %arg1: i32, %arg2: memref<1x8x32xf32, #tpu.memory_space<vmem>>, %arg3: memref<1x8x32xf32, #tpu.memory_space<vmem>>, %arg4: memref<1x8x32xf32, #tpu.memory_space<vmem>>, %arg5: memref<32x32xf32, #tpu.memory_space<vmem>>, %arg6: memref<32x32xf32, #tpu.memory_space<vmem>>, %arg7: memref<32x32xf32, #tpu.memory_space<vmem>>, %arg8: memref<32x32xf32, #tpu.memory_space<vmem>>, %arg9: memref<1x32xf32, #tpu.memory_space<vmem>>, %arg10: memref<1x32xf32, #tpu.memory_space<vmem>>, %arg11: memref<1x8x32xf32, #tpu.memory_space<vmem>>, %arg12: memref<1x2x8x8xf32, #tpu.memory_space<vmem>>, %arg13: memref<8x32xf32, #tpu.memory_space<vmem>>, %arg14: memref<8x32xf32, #tpu.memory_space<vmem>>) attributes {dimension_semantics = [#tpu.dimension_semantics<parallel>, #tpu.dimension_semantics<arbitrary>], iteration_bounds = array<i64: 2, 1>, scalar_prefetch = 0 : i64, scratch_operands = 2 : i64, tpu.core_type = #tpu.core_type<tc>, window_params = [{transform_indices = @transform_0, window_bounds = array<i64: 1, 8, 32>}, {transform_indices = @transform_1, window_bounds = array<i64: 1, 8, 32>}, {transform_indices = @transform_2, window_bounds = array<i64: 1, 8, 32>}, {pipeline_mode = #tpu.pipeline_mode<synchronous>, transform_indices = @transform_3, window_bounds = array<i64: 32, 32>}, {pipeline_mode = #tpu.pipeline_mode<synchronous>, transform_indices = @transform_4, window_bounds = array<i64: 32, 32>}, {pipeline_mode = #tpu.pipeline_mode<synchronous>, transform_indices = @transform_5, window_bounds = array<i64: 32, 32>}, {pipeline_mode = #tpu.pipeline_mode<synchronous>, transform_indices = @transform_6, window_bounds = array<i64: 32, 32>}, {pipeline_mode = #tpu.pipeline_mode<synchronous>, transform_indices = @transform_7, window_bounds = array<i64: 1, 32>}, {pipeline_mode = #tpu.pipeline_mode<synchronous>, transform_indices = @transform_8, window_bounds = array<i64: 1, 32>}, {transform_indices = @transform_9, window_bounds = array<i64: 1, 8, 32>}, {transform_indices = @transform_10, window_bounds = array<i64: 1, 2, 8, 8>}]} {
    %c0 = arith.constant 0 : index
    %c0_0 = arith.constant 0 : index
    %0 = vector.load %arg9[%c0, %c0_0] : memref<1x32xf32, #tpu.memory_space<vmem>>, vector<1x32xf32>
    %c0_1 = arith.constant 0 : index
    %c0_2 = arith.constant 0 : index
    %1 = vector.load %arg10[%c0_1, %c0_2] : memref<1x32xf32, #tpu.memory_space<vmem>>, vector<1x32xf32>
    %c0_3 = arith.constant 0 : index
    %c0_4 = arith.constant 0 : index
    %c0_5 = arith.constant 0 : index
    %2 = vector.load %arg2[%c0_3, %c0_4, %c0_5] : memref<1x8x32xf32, #tpu.memory_space<vmem>>, vector<1x8x32xf32>
    %3 = vector.shape_cast %2 : vector<1x8x32xf32> to vector<8x32xf32>
    %cst = arith.constant dense<0.000000e+00> : vector<8xf32>
    %4 = vector.multi_reduction <add>, %3, %cst [1] : vector<8x32xf32> to vector<8xf32>
    %5 = vector.shape_cast %4 : vector<8xf32> to vector<8x1xf32>
    %cst_6 = arith.constant 3.200000e+01 : f32
    %6 = vector.broadcast %cst_6 : f32 to vector<8x1xf32>
    %7 = arith.divf %5, %6 : vector<8x1xf32>
    %8 = vector.broadcast %7 : vector<8x1xf32> to vector<8x32xf32>
    %9 = arith.subf %3, %8 : vector<8x32xf32>
    %10 = arith.mulf %9, %9 : vector<8x32xf32>
    %cst_7 = arith.constant dense<0.000000e+00> : vector<8xf32>
    %11 = vector.multi_reduction <add>, %10, %cst_7 [1] : vector<8x32xf32> to vector<8xf32>
    %12 = vector.shape_cast %11 : vector<8xf32> to vector<8x1xf32>
    %cst_8 = arith.constant 3.200000e+01 : f32
    %13 = vector.broadcast %cst_8 : f32 to vector<8x1xf32>
    %14 = arith.divf %12, %13 : vector<8x1xf32>
    %15 = vector.broadcast %7 : vector<8x1xf32> to vector<8x32xf32>
    %16 = arith.subf %3, %15 : vector<8x32xf32>
    %cst_9 = arith.constant 9.99999997E-7 : f32
    %17 = vector.broadcast %cst_9 : f32 to vector<8x1xf32>
    %18 = arith.addf %14, %17 : vector<8x1xf32>
    %19 = math.rsqrt %18 : vector<8x1xf32>
    %20 = vector.broadcast %19 : vector<8x1xf32> to vector<8x32xf32>
    %21 = arith.mulf %16, %20 : vector<8x32xf32>
    %22 = vector.broadcast %0 : vector<1x32xf32> to vector<8x32xf32>
    %23 = arith.mulf %21, %22 : vector<8x32xf32>
    %24 = vector.broadcast %1 : vector<1x32xf32> to vector<8x32xf32>
    %25 = arith.addf %23, %24 : vector<8x32xf32>
    %c0_i32 = arith.constant 0 : i32
    %26 = arith.cmpi eq, %arg1, %c0_i32 : i32
    %27 = arith.extui %26 : i1 to i32
    %c0_i32_10 = arith.constant 0 : i32
    %28 = arith.cmpi ne, %27, %c0_i32_10 : i32
    scf.if %28 {
      %c0_46 = arith.constant 0 : index
      %c0_47 = arith.constant 0 : index
      %c0_48 = arith.constant 0 : index
      %106 = vector.load %arg3[%c0_46, %c0_47, %c0_48] : memref<1x8x32xf32, #tpu.memory_space<vmem>>, vector<1x8x32xf32>
      %107 = vector.shape_cast %106 : vector<1x8x32xf32> to vector<8x32xf32>
      %cst_49 = arith.constant dense<0.000000e+00> : vector<8xf32>
      %108 = vector.multi_reduction <add>, %107, %cst_49 [1] : vector<8x32xf32> to vector<8xf32>
      %109 = vector.shape_cast %108 : vector<8xf32> to vector<8x1xf32>
      %cst_50 = arith.constant 3.200000e+01 : f32
      %110 = vector.broadcast %cst_50 : f32 to vector<8x1xf32>
      %111 = arith.divf %109, %110 : vector<8x1xf32>
      %112 = vector.broadcast %111 : vector<8x1xf32> to vector<8x32xf32>
      %113 = arith.subf %107, %112 : vector<8x32xf32>
      %114 = arith.mulf %113, %113 : vector<8x32xf32>
      %cst_51 = arith.constant dense<0.000000e+00> : vector<8xf32>
      %115 = vector.multi_reduction <add>, %114, %cst_51 [1] : vector<8x32xf32> to vector<8xf32>
      %116 = vector.shape_cast %115 : vector<8xf32> to vector<8x1xf32>
      %cst_52 = arith.constant 3.200000e+01 : f32
      %117 = vector.broadcast %cst_52 : f32 to vector<8x1xf32>
      %118 = arith.divf %116, %117 : vector<8x1xf32>
      %119 = vector.broadcast %111 : vector<8x1xf32> to vector<8x32xf32>
      %120 = arith.subf %107, %119 : vector<8x32xf32>
      %cst_53 = arith.constant 9.99999997E-7 : f32
      %121 = vector.broadcast %cst_53 : f32 to vector<8x1xf32>
      %122 = arith.addf %118, %121 : vector<8x1xf32>
      %123 = math.rsqrt %122 : vector<8x1xf32>
      %124 = vector.broadcast %123 : vector<8x1xf32> to vector<8x32xf32>
      %125 = arith.mulf %120, %124 : vector<8x32xf32>
      %126 = vector.broadcast %0 : vector<1x32xf32> to vector<8x32xf32>
      %127 = arith.mulf %125, %126 : vector<8x32xf32>
      %128 = vector.broadcast %1 : vector<1x32xf32> to vector<8x32xf32>
      %129 = arith.addf %127, %128 : vector<8x32xf32>
      %c0_54 = arith.constant 0 : index
      %c0_55 = arith.constant 0 : index
      %c0_56 = arith.constant 0 : index
      %130 = vector.load %arg4[%c0_54, %c0_55, %c0_56] : memref<1x8x32xf32, #tpu.memory_space<vmem>>, vector<1x8x32xf32>
      %131 = vector.shape_cast %130 : vector<1x8x32xf32> to vector<8x32xf32>
      %cst_57 = arith.constant dense<0.000000e+00> : vector<8xf32>
      %132 = vector.multi_reduction <add>, %131, %cst_57 [1] : vector<8x32xf32> to vector<8xf32>
      %133 = vector.shape_cast %132 : vector<8xf32> to vector<8x1xf32>
      %cst_58 = arith.constant 3.200000e+01 : f32
      %134 = vector.broadcast %cst_58 : f32 to vector<8x1xf32>
      %135 = arith.divf %133, %134 : vector<8x1xf32>
      %136 = vector.broadcast %135 : vector<8x1xf32> to vector<8x32xf32>
      %137 = arith.subf %131, %136 : vector<8x32xf32>
      %138 = arith.mulf %137, %137 : vector<8x32xf32>
      %cst_59 = arith.constant dense<0.000000e+00> : vector<8xf32>
      %139 = vector.multi_reduction <add>, %138, %cst_59 [1] : vector<8x32xf32> to vector<8xf32>
      %140 = vector.shape_cast %139 : vector<8xf32> to vector<8x1xf32>
      %cst_60 = arith.constant 3.200000e+01 : f32
      %141 = vector.broadcast %cst_60 : f32 to vector<8x1xf32>
      %142 = arith.divf %140, %141 : vector<8x1xf32>
      %143 = vector.broadcast %135 : vector<8x1xf32> to vector<8x32xf32>
      %144 = arith.subf %131, %143 : vector<8x32xf32>
      %cst_61 = arith.constant 9.99999997E-7 : f32
      %145 = vector.broadcast %cst_61 : f32 to vector<8x1xf32>
      %146 = arith.addf %142, %145 : vector<8x1xf32>
      %147 = math.rsqrt %146 : vector<8x1xf32>
      %148 = vector.broadcast %147 : vector<8x1xf32> to vector<8x32xf32>
      %149 = arith.mulf %144, %148 : vector<8x32xf32>
      %150 = vector.broadcast %0 : vector<1x32xf32> to vector<8x32xf32>
      %151 = arith.mulf %149, %150 : vector<8x32xf32>
      %152 = vector.broadcast %1 : vector<1x32xf32> to vector<8x32xf32>
      %153 = arith.addf %151, %152 : vector<8x32xf32>
      %c0_62 = arith.constant 0 : index
      %c0_63 = arith.constant 0 : index
      %154 = vector.load %arg6[%c0_62, %c0_63] : memref<32x32xf32, #tpu.memory_space<vmem>>, vector<32x32xf32>
      %cst_64 = arith.constant dense<0.000000e+00> : vector<8x32xf32>
      %155 = tpu.matmul %129, %154, %cst_64 {dimension_numbers = #tpu.dot_dimension_numbers<[1], [0], [0], [1], [0, 0, 1, 1], [], []>} : vector<8x32xf32>, vector<32x32xf32>, vector<8x32xf32> -> vector<8x32xf32>
      %c0_65 = arith.constant 0 : index
      %c0_66 = arith.constant 0 : index
      %156 = vector.load %arg13[%c0_65, %c0_66] : memref<8x32xf32, #tpu.memory_space<vmem>>, vector<8x32xf32>
      tpu.vector_store %arg13[%c0_65, %c0_66], %155 {strides = array<i32>} : memref<8x32xf32, #tpu.memory_space<vmem>>, vector<8x32xf32>,
      %c0_67 = arith.constant 0 : index
      %c0_68 = arith.constant 0 : index
      %157 = vector.load %arg7[%c0_67, %c0_68] : memref<32x32xf32, #tpu.memory_space<vmem>>, vector<32x32xf32>
      %cst_69 = arith.constant dense<0.000000e+00> : vector<8x32xf32>
      %158 = tpu.matmul %153, %157, %cst_69 {dimension_numbers = #tpu.dot_dimension_numbers<[1], [0], [0], [1], [0, 0, 1, 1], [], []>} : vector<8x32xf32>, vector<32x32xf32>, vector<8x32xf32> -> vector<8x32xf32>
      %c0_70 = arith.constant 0 : index
      %c0_71 = arith.constant 0 : index
      %159 = vector.load %arg14[%c0_70, %c0_71] : memref<8x32xf32, #tpu.memory_space<vmem>>, vector<8x32xf32>
      tpu.vector_store %arg14[%c0_70, %c0_71], %158 {strides = array<i32>} : memref<8x32xf32, #tpu.memory_space<vmem>>, vector<8x32xf32>,
    } else {
    }
    %c0_11 = arith.constant 0 : index
    %c0_12 = arith.constant 0 : index
    %29 = vector.load %arg5[%c0_11, %c0_12] : memref<32x32xf32, #tpu.memory_space<vmem>>, vector<32x32xf32>
    %cst_13 = arith.constant dense<0.000000e+00> : vector<8x32xf32>
    %30 = tpu.matmul %25, %29, %cst_13 {dimension_numbers = #tpu.dot_dimension_numbers<[1], [0], [0], [1], [0, 0, 1, 1], [], []>} : vector<8x32xf32>, vector<32x32xf32>, vector<8x32xf32> -> vector<8x32xf32>
    %c0_14 = arith.constant 0 : index
    %c0_15 = arith.constant 0 : index
    %31 = vector.load %arg13[%c0_14, %c0_15] : memref<8x32xf32, #tpu.memory_space<vmem>>, vector<8x32xf32>
    %c0_16 = arith.constant 0 : index
    %c0_17 = arith.constant 0 : index
    %32 = vector.load %arg14[%c0_16, %c0_17] : memref<8x32xf32, #tpu.memory_space<vmem>>, vector<8x32xf32>
    %33 = vector.extract_strided_slice %30 {offsets = [0, 0], sizes = [8, 16], strides = [1, 1]} : vector<8x32xf32> to vector<8x16xf32>
    %34 = vector.extract_strided_slice %31 {offsets = [0, 0], sizes = [8, 16], strides = [1, 1]} : vector<8x32xf32> to vector<8x16xf32>
    %35 = vector.extract_strided_slice %32 {offsets = [0, 0], sizes = [8, 16], strides = [1, 1]} : vector<8x32xf32> to vector<8x16xf32>
    %cst_18 = arith.constant dense<0.000000e+00> : vector<8x8xf32>
    %36 = tpu.matmul %33, %34, %cst_18 {dimension_numbers = #tpu.dot_dimension_numbers<[1], [1], [0], [0], [0, 0, 1, 0], [], []>} : vector<8x16xf32>, vector<8x16xf32>, vector<8x8xf32> -> vector<8x8xf32>
    %cst_19 = arith.constant dense<0xFF800000> : vector<8xf32>
    %37 = vector.multi_reduction <maximumf>, %36, %cst_19 [1] : vector<8x8xf32> to vector<8xf32>
    %38 = vector.shape_cast %37 : vector<8xf32> to vector<8x1xf32>
    %39 = vector.broadcast %38 : vector<8x1xf32> to vector<8x8xf32>
    %40 = arith.subf %36, %39 : vector<8x8xf32>
    %41 = math.exp %40 : vector<8x8xf32>
    %cst_20 = arith.constant dense<0.000000e+00> : vector<8xf32>
    %42 = vector.multi_reduction <add>, %41, %cst_20 [1] : vector<8x8xf32> to vector<8xf32>
    %43 = vector.shape_cast %42 : vector<8xf32> to vector<8x1xf32>
    %44 = tpu.reciprocal %43 {approx = true} : vector<8x1xf32> -> vector<8x1xf32>
    %45 = arith.mulf %43, %44 : vector<8x1xf32>
    %cst_21 = arith.constant 2.000000e+00 : f32
    %46 = vector.broadcast %cst_21 : f32 to vector<8x1xf32>
    %47 = arith.subf %46, %45 : vector<8x1xf32>
    %48 = arith.mulf %44, %47 : vector<8x1xf32>
    %49 = vector.broadcast %48 : vector<8x1xf32> to vector<8x8xf32>
    %50 = arith.mulf %41, %49 : vector<8x8xf32>
    %c0_22 = arith.constant 0 : index
    %c0_23 = arith.constant 0 : index
    %c0_24 = arith.constant 0 : index
    %c0_25 = arith.constant 0 : index
    %51 = vector.load %arg12[%c0_22, %c0_23, %c0_24, %c0_25] : memref<1x2x8x8xf32, #tpu.memory_space<vmem>>, vector<1x1x8x8xf32>
    %52 = vector.shape_cast %51 : vector<1x1x8x8xf32> to vector<8x8xf32>
    %53 = vector.shape_cast %50 : vector<8x8xf32> to vector<1x1x8x8xf32>
    tpu.vector_store %arg12[%c0_22, %c0_23, %c0_24, %c0_25], %53 {strides = array<i32>} : memref<1x2x8x8xf32, #tpu.memory_space<vmem>>, vector<1x1x8x8xf32>,
    %cst_26 = arith.constant dense<0.000000e+00> : vector<8x16xf32>
    %54 = tpu.matmul %50, %35, %cst_26 {dimension_numbers = #tpu.dot_dimension_numbers<[1], [0], [0], [1], [0, 0, 1, 1], [], []>} : vector<8x8xf32>, vector<8x16xf32>, vector<8x16xf32> -> vector<8x16xf32>
    %55 = vector.extract_strided_slice %30 {offsets = [0, 16], sizes = [8, 16], strides = [1, 1]} : vector<8x32xf32> to vector<8x16xf32>
    %56 = vector.extract_strided_slice %31 {offsets = [0, 16], sizes = [8, 16], strides = [1, 1]} : vector<8x32xf32> to vector<8x16xf32>
    %57 = vector.extract_strided_slice %32 {offsets = [0, 16], sizes = [8, 16], strides = [1, 1]} : vector<8x32xf32> to vector<8x16xf32>
    %cst_27 = arith.constant dense<0.000000e+00> : vector<8x8xf32>
    %58 = tpu.matmul %55, %56, %cst_27 {dimension_numbers = #tpu.dot_dimension_numbers<[1], [1], [0], [0], [0, 0, 1, 0], [], []>} : vector<8x16xf32>, vector<8x16xf32>, vector<8x8xf32> -> vector<8x8xf32>
    %cst_28 = arith.constant dense<0xFF800000> : vector<8xf32>
    %59 = vector.multi_reduction <maximumf>, %58, %cst_28 [1] : vector<8x8xf32> to vector<8xf32>
    %60 = vector.shape_cast %59 : vector<8xf32> to vector<8x1xf32>
    %61 = vector.broadcast %60 : vector<8x1xf32> to vector<8x8xf32>
    %62 = arith.subf %58, %61 : vector<8x8xf32>
    %63 = math.exp %62 : vector<8x8xf32>
    %cst_29 = arith.constant dense<0.000000e+00> : vector<8xf32>
    %64 = vector.multi_reduction <add>, %63, %cst_29 [1] : vector<8x8xf32> to vector<8xf32>
    %65 = vector.shape_cast %64 : vector<8xf32> to vector<8x1xf32>
    %66 = tpu.reciprocal %65 {approx = true} : vector<8x1xf32> -> vector<8x1xf32>
    %67 = arith.mulf %65, %66 : vector<8x1xf32>
    %cst_30 = arith.constant 2.000000e+00 : f32
    %68 = vector.broadcast %cst_30 : f32 to vector<8x1xf32>
    %69 = arith.subf %68, %67 : vector<8x1xf32>
    %70 = arith.mulf %66, %69 : vector<8x1xf32>
    %71 = vector.broadcast %70 : vector<8x1xf32> to vector<8x8xf32>
    %72 = arith.mulf %63, %71 : vector<8x8xf32>
    %c0_31 = arith.constant 0 : index
    %c1 = arith.constant 1 : index
    %c0_32 = arith.constant 0 : index
    %c0_33 = arith.constant 0 : index
    %73 = vector.load %arg12[%c0_31, %c1, %c0_32, %c0_33] : memref<1x2x8x8xf32, #tpu.memory_space<vmem>>, vector<1x1x8x8xf32>
    %74 = vector.shape_cast %73 : vector<1x1x8x8xf32> to vector<8x8xf32>
    %75 = vector.shape_cast %72 : vector<8x8xf32> to vector<1x1x8x8xf32>
    tpu.vector_store %arg12[%c0_31, %c1, %c0_32, %c0_33], %75 {strides = array<i32>} : memref<1x2x8x8xf32, #tpu.memory_space<vmem>>, vector<1x1x8x8xf32>,
    %cst_34 = arith.constant dense<0.000000e+00> : vector<8x16xf32>
    %76 = tpu.matmul %72, %57, %cst_34 {dimension_numbers = #tpu.dot_dimension_numbers<[1], [0], [0], [1], [0, 0, 1, 1], [], []>} : vector<8x8xf32>, vector<8x16xf32>, vector<8x16xf32> -> vector<8x16xf32>
    %77 = tpu.concatenate %54, %76 in 1 : vector<8x16xf32>, vector<8x16xf32> -> vector<8x32xf32>
    %c0_35 = arith.constant 0 : index
    %c0_36 = arith.constant 0 : index
    %78 = vector.load %arg8[%c0_35, %c0_36] : memref<32x32xf32, #tpu.memory_space<vmem>>, vector<32x32xf32>
    %cst_37 = arith.constant dense<0.000000e+00> : vector<8x32xf32>
    %79 = tpu.matmul %77, %78, %cst_37 {dimension_numbers = #tpu.dot_dimension_numbers<[1], [0], [0], [1], [0, 0, 1, 1], [], []>} : vector<8x32xf32>, vector<32x32xf32>, vector<8x32xf32> -> vector<8x32xf32>
    %80 = arith.addf %79, %3 : vector<8x32xf32>
    %cst_38 = arith.constant dense<0.000000e+00> : vector<8xf32>
    %81 = vector.multi_reduction <add>, %80, %cst_38 [1] : vector<8x32xf32> to vector<8xf32>
    %82 = vector.shape_cast %81 : vector<8xf32> to vector<8x1xf32>
    %cst_39 = arith.constant 3.200000e+01 : f32
    %83 = vector.broadcast %cst_39 : f32 to vector<8x1xf32>
    %84 = arith.divf %82, %83 : vector<8x1xf32>
    %85 = vector.broadcast %84 : vector<8x1xf32> to vector<8x32xf32>
    %86 = arith.subf %80, %85 : vector<8x32xf32>
    %87 = arith.mulf %86, %86 : vector<8x32xf32>
    %cst_40 = arith.constant dense<0.000000e+00> : vector<8xf32>
    %88 = vector.multi_reduction <add>, %87, %cst_40 [1] : vector<8x32xf32> to vector<8xf32>
    %89 = vector.shape_cast %88 : vector<8xf32> to vector<8x1xf32>
    %cst_41 = arith.constant 3.200000e+01 : f32
    %90 = vector.broadcast %cst_41 : f32 to vector<8x1xf32>
    %91 = arith.divf %89, %90 : vector<8x1xf32>
    %92 = vector.broadcast %84 : vector<8x1xf32> to vector<8x32xf32>
    %93 = arith.subf %80, %92 : vector<8x32xf32>
    %cst_42 = arith.constant 9.99999997E-7 : f32
    %94 = vector.broadcast %cst_42 : f32 to vector<8x1xf32>
    %95 = arith.addf %91, %94 : vector<8x1xf32>
    %96 = math.rsqrt %95 : vector<8x1xf32>
    %97 = vector.broadcast %96 : vector<8x1xf32> to vector<8x32xf32>
    %98 = arith.mulf %93, %97 : vector<8x32xf32>
    %99 = vector.broadcast %0 : vector<1x32xf32> to vector<8x32xf32>
    %100 = arith.mulf %98, %99 : vector<8x32xf32>
    %101 = vector.broadcast %1 : vector<1x32xf32> to vector<8x32xf32>
    %102 = arith.addf %100, %101 : vector<8x32xf32>
    %c0_43 = arith.constant 0 : index
    %c0_44 = arith.constant 0 : index
    %c0_45 = arith.constant 0 : index
    %103 = vector.load %arg11[%c0_43, %c0_44, %c0_45] : memref<1x8x32xf32, #tpu.memory_space<vmem>>, vector<1x8x32xf32>
    %104 = vector.shape_cast %103 : vector<1x8x32xf32> to vector<8x32xf32>
    %105 = vector.shape_cast %102 : vector<8x32xf32> to vector<1x8x32xf32>
    tpu.vector_store %arg11[%c0_43, %c0_44, %c0_45], %105 {strides = array<i32>} : memref<1x8x32xf32, #tpu.memory_space<vmem>>, vector<1x8x32xf32>,
    return
  }
  func.func @transform_0(%arg0: i32, %arg1: i32) -> (i32, i32, i32) {
    %c0_i32 = arith.constant 0 : i32
    %c0_i32_0 = arith.constant 0 : i32
    return %arg0, %arg1, %c0_i32 : i32, i32, i32
  }
  func.func @transform_1(%arg0: i32, %arg1: i32) -> (i32, i32, i32) {
    %c0_i32 = arith.constant 0 : i32
    %c0_i32_0 = arith.constant 0 : i32
    %c0_i32_1 = arith.constant 0 : i32
    return %arg0, %c0_i32, %c0_i32_0 : i32, i32, i32
  }
  func.func @transform_2(%arg0: i32, %arg1: i32) -> (i32, i32, i32) {
    %c0_i32 = arith.constant 0 : i32
    %c0_i32_0 = arith.constant 0 : i32
    %c0_i32_1 = arith.constant 0 : i32
    return %arg0, %c0_i32, %c0_i32_0 : i32, i32, i32
  }
  func.func @transform_3(%arg0: i32, %arg1: i32) -> (i32, i32) {
    %c0_i32 = arith.constant 0 : i32
    %c0_i32_0 = arith.constant 0 : i32
    %c0_i32_1 = arith.constant 0 : i32
    return %c0_i32, %c0_i32_0 : i32, i32
  }
  func.func @transform_4(%arg0: i32, %arg1: i32) -> (i32, i32) {
    %c0_i32 = arith.constant 0 : i32
    %c0_i32_0 = arith.constant 0 : i32
    %c0_i32_1 = arith.constant 0 : i32
    return %c0_i32, %c0_i32_0 : i32, i32
  }
  func.func @transform_5(%arg0: i32, %arg1: i32) -> (i32, i32) {
    %c0_i32 = arith.constant 0 : i32
    %c0_i32_0 = arith.constant 0 : i32
    %c0_i32_1 = arith.constant 0 : i32
    return %c0_i32, %c0_i32_0 : i32, i32
  }
  func.func @transform_6(%arg0: i32, %arg1: i32) -> (i32, i32) {
    %c0_i32 = arith.constant 0 : i32
    %c0_i32_0 = arith.constant 0 : i32
    %c0_i32_1 = arith.constant 0 : i32
    return %c0_i32, %c0_i32_0 : i32, i32
  }
  func.func @transform_7(%arg0: i32, %arg1: i32) -> (i32, i32) {
    %c0_i32 = arith.constant 0 : i32
    %c0_i32_0 = arith.constant 0 : i32
    %c0_i32_1 = arith.constant 0 : i32
    return %c0_i32, %c0_i32_0 : i32, i32
  }
  func.func @transform_8(%arg0: i32, %arg1: i32) -> (i32, i32) {
    %c0_i32 = arith.constant 0 : i32
    %c0_i32_0 = arith.constant 0 : i32
    %c0_i32_1 = arith.constant 0 : i32
    return %c0_i32, %c0_i32_0 : i32, i32
  }
  func.func @transform_9(%arg0: i32, %arg1: i32) -> (i32, i32, i32) {
    %c0_i32 = arith.constant 0 : i32
    %c0_i32_0 = arith.constant 0 : i32
    return %arg0, %arg1, %c0_i32 : i32, i32, i32
  }
  func.func @transform_10(%arg0: i32, %arg1: i32) -> (i32, i32, i32, i32) {
    %c0_i32 = arith.constant 0 : i32
    %c0_i32_0 = arith.constant 0 : i32
    %c0_i32_1 = arith.constant 0 : i32
    return %arg0, %c0_i32, %arg1, %c0_i32_0 : i32, i32, i32, i32
  }
}

</mosaic_0001>

<bundles_post_ra>
// kernel: tpu_custom_call.1
= control target key start
LH: loop header
LB: loop body
LE: loop exit
PB: predicated region body
PF: predicated region fallthrough
CT: control target
= control target key end

     0   :  { %s2718_s0 = inlined_call_operand.hbm [shape: f32[2,8,32], index: 0, kind: input, shape index: {}]   ;;  %s2719_s1 = inlined_call_operand.hbm [shape: f32[2,8,32], index: 1, kind: input, shape index: {}]   ;;  %s2720_s2 = inlined_call_operand.hbm [shape: f32[2,8,32], index: 2, kind: input, shape index: {}]   ;;  %s2721_s3 = inlined_call_operand.hbm [shape: f32[32,32], index: 3, kind: input, shape index: {}]   ;;  %s2722_s4 = inlined_call_operand.hbm [shape: f32[32,32], index: 4, kind: input, shape index: {}]   ;;  %s2723_s5 = inlined_call_operand.hbm [shape: f32[32,32], index: 5, kind: input, shape index: {}]   ;;  %s2724_s6 = inlined_call_operand.hbm [shape: f32[32,32], index: 6, kind: input, shape index: {}]   ;;  %s2725_s7 = inlined_call_operand.vmem [shape: f32[1,32], index: 7, kind: input, shape index: {}]   ;;  %s2726_s8 = inlined_call_operand.vmem [shape: f32[1,32], index: 8, kind: input, shape index: {}]   ;;  %s2727_s9 = inlined_call_operand.hbm [shape: f32[2,8,32], index: 9, kind: output, shape index: {0}]   ;;  %s2728_s10 = inlined_call_operand.hbm [shape: f32[2,2,8,8], index: 10, kind: output, shape index: {1}]  }
   0x1   :  { %2757 = sst [smem:[#allocation33_spill]] %s2719_s1 }
   0x2   :  { %2758 = sst [smem:[#allocation34_spill]] %s2721_s3 }
   0x3   :  { %2759 = sst [smem:[#allocation35_spill]] %s2723_s5 }
   0x4   :  { %2760 = sst [smem:[#allocation36_spill]] %s2727_s9 }
   0x5   :  { %2761 = sst [smem:[#allocation37_spill]] %s2728_s10 }
   0x6   :  { %16 = vsyncpa [#allocation5], 0 }
   0x7   :  { %18 = vsyncpa [#allocation5 + $0x1], 0 }
   0x8   :  { %19 = vsyncpa [#allocation8], 0 }
   0x9   :  { %21 = vsyncpa [#allocation8 + $0x1], 0 }
   0xa   :  { %22 = vsyncpa [#allocation11], 0 }
   0xb   :  { %23 = vsyncpa [#allocation14], 0 }
   0xc   :  { %24 = vsyncpa [#allocation6], 0 }
   0xd   :  { %26 = vsyncpa [#allocation6 + $0x1], 0 }
   0xe   :  { %27 = vsyncpa [#allocation18], 0 }
   0xf   :  { %29 = vsyncpa [#allocation18 + $0x1], 0  ;;  %s2211_s13 = smov 0   ;;  %s2213_s14 = smov 0  }
  0x10   :  { %s2215_s15 = smov 0   ;;  %s2217_s16 = smov 0  }
  0x11   :  { %s2219_s17 = smov 0   ;;  %s2221_s18 = smov 0  }
  0x12 LB: > { %2762 = sst [smem:[#allocation25_spill]] %s2116_s13  ;;  %s2242_s19 = sadd.s32 4294967295, %s2136_s18   ;;  %s2136_s18 = sphi %s2221_s18, %s35_s18   ;;  %s2132_s17 = sphi %s2219_s17, %s2808_s17   ;;  %s2128_s16 = sphi %s2217_s16, %s2807_s16   ;;  %s2124_s15 = sphi %s2215_s15, %s2811_s15   ;;  %s2120_s14 = sphi %s2213_s14, %s2810_s14   ;;  %s2116_s13 = sphi %s2211_s13, %s2809_s13  }
  0x13   : > { %2763 = sst [smem:[#allocation26_spill]] %s2128_s16  ;;  %p1506_p0 = scmp.ge.s32.totalorder %s2136_s18, 1 }
  0x14   : > { %2764 = sst [smem:[#allocation27_spill]] %s2132_s17  ;;  %p2741_p1 = scmp.eq.s32.totalorder %s2242_s19, 0 }
  0x15   : > { %2765 = sst [smem:[#allocation28_spill]] %s2136_s18  ;;  %p314_p2 = scmp.lt.s32.totalorder %s2136_s18, 3 }
  0x16   : > { %s2138_s21 = smov [#allocation10]   ;;  %s2139_s24 = smov [#allocation13]  }
  0x17   : > { %p2247_p3 = pnand %p1506_p0, %p314_p2  ;;  %s326_s22 = sshll.u32 %s2138_s21, 4  ;;  %s2251_s22 = int_to_ptr.vmem [resolvable:$true] %s326_s22 }
  0x18   : > { %s352_s25 = sshll.u32 %s2139_s24, 4  ;;  %s2768_s3 = sld [smem:[#allocation34_spill]]  ;;  %s2262_s25 = int_to_ptr.vmem [resolvable:$true] %s352_s25 }
  0x19   : > { %s2766_s20 = scalar_select %p2247_p3, 1, 0 }
  0x1a   : > { %p1691_p4 = pneg %p2247_p3 }
  0x1c   : > { %p2258_p6 = pnand %p1691_p4, %p2741_p1 }
  0x1e   : > { %s2767_s23 = scalar_select %p2258_p6, 1, 0 }
  0x1f   : > { %s1808_s28 = scalar_lea.hbm %s2768_s3, 512  ;;  %p2272_p8 = pneg %p2258_p6 }
  0x20   : > { %p1809_p7 = scmp.ne.s32.totalorder %s2768_s3, %s1808_s28  ;;  %p1815_p11 = scmp.lt.u32.totalorder %s1808_s28, %s2768_s3 }
  0x21   : > { %s2769_s11 = scalar_select %p2272_p8, 1, 0 }
  0x22   : > { %p1811_p9 = pnand %p2272_p8, %p1809_p7 }
  0x24   : > { %p1812_p10 = pneg %p1811_p9 }
  0x26   : > { %p1817_p12 = pnand %p1815_p11, %p1812_p10 }
  0x28   : > { %1820 = shalt.err (!%p1817_p12)
}
  0x29   : > { %s1821_s24 = scalar_lea.vmem %s2251_s22, 512  ;;  %p1829_p4 = scmp.lt.s32.totalorder %s2251_s22, %s2251_s22 }
  0x2a   : > { %p1822_p13 = scmp.ne.s32.totalorder %s2251_s22, %s1821_s24  ;;  %p1830_p5 = scmp.lt.s32.totalorder %s1821_s24, %s1821_s24 }
  0x2c   : > { %p1824_p0 = pnand %p1822_p13, %p2272_p8  ;;  %p1831_p7 = por %p1830_p5, %p1829_p4 }
  0x2e   : > { %p1825_p2 = pneg %p1824_p0 }
  0x30   : > { %p1832_p9 = pnand %p1831_p7, %p1825_p2 }
  0x32   : > { %1835 = shalt.err (!%p1832_p9)
}
  0x33   : > { %s2732_s26 = smov 128   ;;  %s2734_s27 = smov 8  }
  0x34   : > { %1694 = dma.hbm_to_vmem [thread:$0]  (!%p2258_p6), %s2768_s3, 512, %s2251_s22, [#allocation11], %s2732_s26, %s2732_s26, %s2734_s27  }
  0x35   : > { %s2770_s5 = sld [smem:[#allocation35_spill]] }
  0x3b   : > { %s1836_s21 = scalar_lea.hbm %s2770_s5, 512 }
  0x3c   : > { %p1837_p5 = scmp.ne.s32.totalorder %s2770_s5, %s1836_s21  ;;  %p1843_p12 = scmp.lt.u32.totalorder %s1836_s21, %s2770_s5 }
  0x3e   : > { %p1839_p10 = pnand %p1837_p5, %p2272_p8 }
  0x40   : > { %p1840_p11 = pneg %p1839_p10 }
  0x42   : > { %p1845_p13 = pnand %p1843_p12, %p1840_p11 }
  0x44   : > { %1848 = shalt.err (!%p1845_p13)
}
  0x45   : > { %s1849_s22 = scalar_lea.vmem %s2262_s25, 512  ;;  %p1857_p7 = scmp.lt.s32.totalorder %s2262_s25, %s2262_s25 }
  0x46   : > { %p1850_p0 = scmp.ne.s32.totalorder %s2262_s25, %s1849_s22  ;;  %p1858_p9 = scmp.lt.s32.totalorder %s1849_s22, %s1849_s22 }
  0x48   : > { %p1852_p2 = pnand %p1850_p0, %p2272_p8  ;;  %p1859_p5 = por %p1858_p9, %p1857_p7 }
  0x4a   : > { %p1853_p4 = pneg %p1852_p2 }
  0x4c   : > { %p1860_p10 = pnand %p1859_p5, %p1853_p4 }
  0x4e   : > { %1863 = shalt.err (!%p1860_p10)
}
  0x4f   : > { %1700 = dma.hbm_to_vmem [thread:$0]  (!%p2258_p6), %s2770_s5, 512, %s2262_s25, [#allocation14], %s2732_s26, %s2732_s26, %s2734_s27  }
  0x50   : > { %s1505_s16 = sadd.s32 4294967294, %s2136_s18   ;;  %s47_s28 = sadd.s32 1, %s2132_s17 }
  0x51   : > { %p49_p11 = scmp.ge.s32.totalorder %s47_s28, 2  ;;  %s56_s29 = sadd.s32 1, %s2124_s15 }
  0x52   : > { %p63_p12 = scmp.ne.s32.totalorder %s2124_s15, %s2120_s14  ;;  %p64_p13 = scmp.eq.s32.totalorder %s2136_s18, 0 }
  0x53   : > { %s2813_s28 = smov (%p49_p11, %s47_s28), 0  ;;  %p69_p2 = scmp.ne.s32.totalorder %s2120_s14, %s2116_s13 }
  0x54   : > { %2771 = sst [smem:[#allocation29_spill]] %s2813_s28  ;;  %p2330_p0 = por %p64_p13, %p63_p12 }
  0x55   : > { %s51_s25 = ssub.s32 %s2132_s17, %s2813_s28  ;;  %p273_p4 = scmp.eq.s32.totalorder %s2242_s19, 1 }
  0x56   : > { %p54_p7 = scmp.eq.s32.totalorder %s51_s25, 0  ;;  %p2341_p9 = por %p2741_p1, %p69_p2 }
  0x57   : > { %p2345_p5 = por %p273_p4, %p63_p12  ;;  %p279_p10 = scmp.eq.s32.totalorder %s1505_s16, 1 }
  0x58   : > { %s2773_s12 = scalar_select %p2341_p9, 1, 0 }
  0x59   : > { %s2774_s21 = scalar_select %p2345_p5, 1, 0 }
  0x5a   : > { %s2350_s24 = scalar_select %p54_p7, %s2124_s15, %s56_s29  }
  0x5b   : > { %2775 = sst [smem:[#allocation30_spill]] %s2774_s21  ;;  %p2352_p11 = por %p279_p10, %p69_p2 }
  0x5c   : > { %2776 = sst [smem:[#allocation31_spill]] %s2350_s24  ;;  %p1725_p13 = scmp.lt.s32.totalorder %s2136_s18, 2 }
  0x5d   : > { %s2777_s22 = scalar_select %p2352_p11, 1, 0 }
  0x5e   : > { %s2736_s9 = sand.u32 1, %s2124_s15   ;;  %s2359_s10 = sshll.u32 %s2132_s17, 7 }
  0x5f   : > { %2778 = sst [smem:[#allocation32_spill]] %s2777_s22  ;;  %s2363_s25 = sshll.u32 %s2736_s9, 3 }
  0x60   : > { %p2367_p12 = pnand %p1725_p13, %p2330_p0  ;;  %s404_s16 = sand.u32 1, %s2136_s18  }
  0x61   : > { %s2780_s1 = sld [smem:[#allocation33_spill]]  ;;  %s408_s5 = scalar_lea.vmem [#allocation7], %s2363_s25 }
  0x62   : > { %s2779_s26 = scalar_select %p2367_p12, 1, 0 }
  0x63   : > { %s415_s9 = sshll.u32 %s408_s5, 4  ;;  %s2381_s30 = scalar_lea.sflag [#allocation8], %s404_s16  ;;  %s2379_s9 = int_to_ptr.vmem [resolvable:$true] %s415_s9 }
  0x64   : > { %p2387_p2 = pneg %p2367_p12 }
  0x66   : > { %s2781_s17 = scalar_select %p2387_p2, 1, 0 }
  0x67   : > { %s2376_s3 = scalar_lea.hbm %s2780_s1, %s2359_s10  ;;  %s1869_s24 = scalar_lea.hbm %s2780_s1, 256 }
  0x68   : > { %s1864_s28 = scalar_lea.hbm %s2376_s3, 128  ;;  %p1870_p10 = scmp.lt.u32.totalorder %s2376_s3, %s2780_s1 }
  0x69   : > { %p1865_p0 = scmp.ne.s32.totalorder %s2376_s3, %s1864_s28  ;;  %p1871_p13 = scmp.lt.u32.totalorder %s1869_s24, %s1864_s28 }
  0x6a   : > { %p1873_p11 = scmp.lt.u32.totalorder %s1864_s28, %s2376_s3 }
  0x6b   : > { %p1867_p4 = pnand %p2387_p2, %p1865_p0  ;;  %p1872_p1 = por %p1871_p13, %p1870_p10 }
  0x6d   : > { %p1868_p7 = pneg %p1867_p4  ;;  %p1874_p5 = por %p1873_p11, %p1872_p1 }
  0x6f   : > { %p1875_p9 = pnand %p1874_p5, %p1868_p7 }
  0x71   : > { %1878 = shalt.err (!%p1875_p9)
}
  0x72   : > { %s1879_s16 = scalar_lea.vmem %s2379_s9, 128  ;;  %s2142_s27 = smov [#allocation7]  }
  0x73   : > { %p1880_p0 = scmp.ne.s32.totalorder %s2379_s9, %s1879_s16  ;;  %s1884_s29 = sshll.u32 %s2142_s27, 4  ;;  %s1885_s29 = int_to_ptr.vmem [resolvable:$false] %s1884_s29 }
  0x74   : > { %s1886_s18 = scalar_lea.vmem %s1885_s29, 256  ;;  %p1887_p6 = scmp.lt.s32.totalorder %s2379_s9, %s1885_s29 }
  0x75   : > { %p1882_p4 = pnand %p1880_p0, %p2387_p2  ;;  %p1888_p8 = scmp.lt.s32.totalorder %s1886_s18, %s1879_s16 }
  0x77   : > { %p1883_p3 = pneg %p1882_p4  ;;  %p1889_p10 = por %p1888_p8, %p1887_p6 }
  0x79   : > { %p1890_p13 = pnand %p1889_p10, %p1883_p3 }
  0x7b   : > { %1893 = shalt.err (!%p1890_p13)
}
  0x7c   : > { %1710 = dma.hbm_to_vmem [thread:$0]  (!%p2367_p12), %s2376_s3, 128, %s2379_s9, %s2381_s30  }
  0x7d   : > { %s2143_s28 = smov [#allocation12]   ;;  %s2144_s5 = smov [#allocation15]  }
  0x7e   : > { %s339_s24 = sshll.u32 %s2143_s28, 4  ;;  %s365_s1 = sshll.u32 %s2144_s5, 4  ;;  %s340_s24 = int_to_ptr.vmem [resolvable:$true] %s339_s24  ;;  %s366_s1 = int_to_ptr.vmem [resolvable:$true] %s365_s1 }
  0x7f   : > { %s1894_s29 = scalar_lea.hbm %s2722_s4, 512  ;;  %p2782_p3 = scmp.ne.s32.totalorder %s2769_s11, 0 }
  0x80   : > { %p1895_p1 = scmp.ne.s32.totalorder %s2722_s4, %s1894_s29  ;;  %p1901_p9 = scmp.lt.u32.totalorder %s1894_s29, %s2722_s4 }
  0x82   : > { %p1897_p6 = pnand %p1895_p1, %p2782_p3 }
  0x84   : > { %p1898_p8 = pneg %p1897_p6 }
  0x86   : > { %p1903_p5 = pnand %p1901_p9, %p1898_p8 }
  0x88   : > { %1906 = shalt.err (!%p1903_p5)
}
  0x89   : > { %s1907_s3 = scalar_lea.vmem %s340_s24, 512  ;;  %p1915_p4 = scmp.lt.s32.totalorder %s340_s24, %s340_s24 }
  0x8a   : > { %p1908_p11 = scmp.ne.s32.totalorder %s340_s24, %s1907_s3  ;;  %p1916_p10 = scmp.lt.s32.totalorder %s1907_s3, %s1907_s3 }
  0x8c   : > { %p1910_p7 = pnand %p1908_p11, %p2782_p3  ;;  %p1917_p13 = por %p1916_p10, %p1915_p4 }
  0x8e   : > { %p1911_p0 = pneg %p1910_p7 }
  0x90   : > { %p1918_p12 = pnand %p1917_p13, %p1911_p0 }
  0x92   : > { %1921 = shalt.err (!%p1918_p12)
}
  0x93   : > { %p2783_p1 = scmp.ne.s32.totalorder %s2767_s23, 0  ;;  %s2784_s22 = smov 8  }
  0x94   : > { %s2785_s9 = smov 128   ;;  %s1922_s27 = scalar_lea.hbm %s2724_s6, 512 }
  0x95   : > { %1697 = dma.hbm_to_vmem [thread:$0]  (!%p2783_p1), %s2722_s4, 512, %s340_s24, [#allocation11], %s2785_s9, %s2785_s9, %s2784_s22  }
  0x96   : > { %p1923_p6 = scmp.ne.s32.totalorder %s2724_s6, %s1922_s27  ;;  %p1929_p9 = scmp.lt.u32.totalorder %s1922_s27, %s2724_s6 }
  0x98   : > { %p1925_p12 = pnand %p1923_p6, %p2782_p3 }
  0x9a   : > { %p1926_p8 = pneg %p1925_p12 }
  0x9c   : > { %p1931_p5 = pnand %p1929_p9, %p1926_p8 }
  0x9e   : > { %1934 = shalt.err (!%p1931_p5)
}
  0x9f   : > { %s1935_s13 = scalar_lea.vmem %s366_s1, 512  ;;  %p1943_p4 = scmp.lt.s32.totalorder %s366_s1, %s366_s1 }
  0xa0   : > { %p1936_p11 = scmp.ne.s32.totalorder %s366_s1, %s1935_s13  ;;  %p1944_p10 = scmp.lt.s32.totalorder %s1935_s13, %s1935_s13 }
  0xa2   : > { %p1938_p7 = pnand %p1936_p11, %p2782_p3  ;;  %p1945_p13 = por %p1944_p10, %p1943_p4 }
  0xa4   : > { %p1939_p0 = pneg %p1938_p7 }
  0xa6   : > { %p1946_p2 = pnand %p1945_p13, %p1939_p0 }
  0xa8   : > { %1949 = shalt.err (!%p1946_p2)
}
  0xa9   : > { %1703 = dma.hbm_to_vmem [thread:$0]  (!%p2783_p1), %s2724_s6, 512, %s366_s1, [#allocation14], %s2785_s9, %s2785_s9, %s2784_s22  }
  0xaa   : > { %s2457_s5 = scalar_lea.hbm %s2718_s0, %s2359_s10  ;;  %s389_s23 = scalar_lea.vmem [#allocation4], %s2363_s25 }
  0xab   : > { %s397_s27 = sshll.u32 %s389_s23, 4  ;;  %s2466_s18 = scalar_lea.hbm %s2720_s2, %s2359_s10  ;;  %s2460_s27 = int_to_ptr.vmem [resolvable:$true] %s397_s27 }
  0xac   : > { %s2786_s3 = sand.u32 1, %s2124_s15   ;;  %s1950_s22 = scalar_lea.hbm %s2457_s5, 128 }
  0xad   : > { %s386_s1 = scalar_lea.sflag [#allocation5], %s2786_s3  ;;  %p1951_p2 = scmp.ne.s32.totalorder %s2457_s5, %s1950_s22 }
  0xae   : > { %p2787_p3 = scmp.ne.s32.totalorder %s2781_s17, 0  ;;  %s1955_s24 = scalar_lea.hbm %s2718_s0, 256 }
  0xaf   : > { %p1956_p12 = scmp.lt.u32.totalorder %s2457_s5, %s2718_s0  ;;  %p1957_p8 = scmp.lt.u32.totalorder %s1955_s24, %s1950_s22 }
  0xb0   : > { %p1953_p1 = pnand %p1951_p2, %p2787_p3  ;;  %p1959_p5 = scmp.lt.u32.totalorder %s1950_s22, %s2457_s5 }
  0xb1   : > { %p1958_p9 = por %p1957_p8, %p1956_p12 }
  0xb2   : > { %p1954_p6 = pneg %p1953_p1 }
  0xb3   : > { %p1960_p11 = por %p1959_p5, %p1958_p9 }
  0xb5   : > { %p1961_p7 = pnand %p1960_p11, %p1954_p6 }
  0xb7   : > { %1964 = shalt.err (!%p1961_p7)
}
  0xb8   : > { %s1965_s10 = scalar_lea.vmem %s2460_s27, 128  ;;  %s2145_s28 = smov [#allocation4]  }
  0xb9   : > { %p1966_p0 = scmp.ne.s32.totalorder %s2460_s27, %s1965_s10  ;;  %s1970_s23 = sshll.u32 %s2145_s28, 4  ;;  %s1971_s23 = int_to_ptr.vmem [resolvable:$false] %s1970_s23 }
  0xba   : > { %s1972_s29 = scalar_lea.vmem %s1971_s23, 256  ;;  %p1973_p13 = scmp.lt.s32.totalorder %s2460_s27, %s1971_s23 }
  0xbb   : > { %p1968_p4 = pnand %p1966_p0, %p2787_p3  ;;  %p1974_p2 = scmp.lt.s32.totalorder %s1972_s29, %s1965_s10 }
  0xbd   : > { %p1969_p10 = pneg %p1968_p4  ;;  %p1975_p1 = por %p1974_p2, %p1973_p13 }
  0xbf   : > { %p1976_p12 = pnand %p1975_p1, %p1969_p10 }
  0xc1   : > { %1979 = shalt.err (!%p1976_p12)
}
  0xc2   : > { %p2788_p6 = scmp.ne.s32.totalorder %s2779_s26, 0  ;;  %s426_s16 = scalar_lea.vmem [#allocation9], %s2363_s25 }
  0xc3   : > { %s433_s3 = sshll.u32 %s426_s16, 4  ;;  %s1980_s22 = scalar_lea.hbm %s2466_s18, 128  ;;  %s434_s3 = int_to_ptr.vmem [resolvable:$true] %s433_s3 }
  0xc4   : > { %1707 = dma.hbm_to_vmem [thread:$0]  (!%p2788_p6), %s2457_s5, 128, %s2460_s27, %s386_s1  }
  0xc5   : > { %p1981_p8 = scmp.ne.s32.totalorder %s2466_s18, %s1980_s22  ;;  %s1985_s24 = scalar_lea.hbm %s2720_s2, 256 }
  0xc6   : > { %p1986_p11 = scmp.lt.u32.totalorder %s2466_s18, %s2720_s2  ;;  %p1987_p7 = scmp.lt.u32.totalorder %s1985_s24, %s1980_s22 }
  0xc7   : > { %p1983_p9 = pnand %p1981_p8, %p2787_p3  ;;  %p1989_p4 = scmp.lt.u32.totalorder %s1980_s22, %s2466_s18 }
  0xc8   : > { %p1988_p0 = por %p1987_p7, %p1986_p11 }
  0xc9   : > { %p1984_p5 = pneg %p1983_p9 }
  0xca   : > { %p1990_p10 = por %p1989_p4, %p1988_p0 }
  0xcc   : > { %p1991_p13 = pnand %p1990_p10, %p1984_p5 }
  0xce   : > { %1994 = shalt.err (!%p1991_p13)
}
  0xcf   : > { %s1995_s25 = scalar_lea.vmem %s434_s3, 128  ;;  %s2146_s5 = smov [#allocation9]  }
  0xd0   : > { %p1996_p2 = scmp.ne.s32.totalorder %s434_s3, %s1995_s25  ;;  %s2000_s27 = sshll.u32 %s2146_s5, 4  ;;  %s2001_s27 = int_to_ptr.vmem [resolvable:$false] %s2000_s27 }
  0xd1   : > { %s2002_s1 = scalar_lea.vmem %s2001_s27, 256  ;;  %p2003_p8 = scmp.lt.s32.totalorder %s434_s3, %s2001_s27 }
  0xd2   : > { %p1998_p1 = pnand %p1996_p2, %p2787_p3  ;;  %p2004_p9 = scmp.lt.s32.totalorder %s2002_s1, %s1995_s25 }
  0xd4   : > { %p1999_p12 = pneg %p1998_p1  ;;  %p2005_p6 = por %p2004_p9, %p2003_p8 }
  0xd6   : > { %p2006_p7 = pnand %p2005_p6, %p1999_p12 }
  0xd8   : > { %2009 = shalt.err (!%p2006_p7)
}
  0xd9   : > { %p2789_p11 = scmp.ne.s32.totalorder %s2779_s26, 0  ;;  %p2790_p5 = scmp.ne.s32.totalorder %s2766_s20, 0 }
  0xda   : > { %s2513_s17 = sand.u32 (!%p2790_p5), 1, %s2120_s14   ;;  %p2791_p3 = scmp.ne.s32.totalorder (!%p2790_p5), %s2773_s12, 0 }
  0xdb   : > { %1713 = dma.hbm_to_vmem [thread:$0]  (!%p2789_p11), %s2466_s18, 128, %s434_s3, %s2381_s30  }
  0xdc   : > { %442 = sbr.rel (%p2790_p5) target bundleno = 2712 (0xa98), region = 56  ;;  %s2516_s10 = sshll.u32 (!%p2790_p5), %s2513_s17, 3 }
  0xdd   : > { %s445_s28 = scalar_lea.sflag (!%p2790_p5), [#allocation5], %s2513_s17  ;;  %s448_s23 = scalar_lea.vmem (!%p2790_p5), [#allocation4], %s2516_s10 }
  0xe3   : > { %2091 = dma.done.wait (%p2791_p3), %s445_s28, 128  }
  0xe4   : > { %2093 = vsyncadd (%p2791_p3), %s445_s28, 4294967168  ;;  %s453_s20 = sand.u32 1, %s2242_s19   ;;  %s457_s30 = scalar_lea.vmem [#allocation7], %s2516_s10 }
  0xe5   : > { %s454_s26 = scalar_lea.sflag [#allocation8], %s453_s20 }
  0xe6   : > { %2095 = dma.done.wait (%p2791_p3), %s454_s26, 256  }
  0xe7   : > { %2097 = vsyncadd (%p2791_p3), %s454_s26, 4294967040  ;;  %s466_s18 = scalar_lea.vmem [#allocation9], %s2516_s10  ;;  %p2792_p6 = scmp.eq.s32.totalorder %s2242_s19, 0 }
  0xe9   : > { %2099 = dma.done.wait (%p2792_p6), [#allocation11], 1024   ;;  %p2793_p0 = pmov %p2792_p6 }
  0xeb   : > { %2101 = vsyncadd (%p2793_p0), [#allocation11], 4294966272  ;;  %p2794_p4 = pmov %p2793_p0 }
  0xec   : > { %p2795_p10 = pmov %p2793_p0 }
  0xed   : > { %2103 = dma.done.wait (%p2794_p4), [#allocation14], 1024  }
  0xee   : > { %2105 = vsyncadd (%p2795_p10), [#allocation14], 4294966272  ;;  %vm537_vm0 = vcmask 261120   ;;  %v570_v0 = vld [vmem:[%s457_s30] sm:$0xff]  ;;  %v2539_v1 = vld [vmem:[%s448_s23] sm:$0xff]  ;;  %v2147_v24 = vmov 0.0|0.0  }
  0xef   : > { %v571_v2 = vsel %vm537_vm0, %v570_v0, 0.0  ;;  %v538_v3 = vsel %vm537_vm0, %v2539_v1, 0.0  ;;  %v586_v4 = vld [vmem:[%s466_s18] sm:$0xff]  ;;  %v602_v21 = vld [vmem:[#allocation12] sm:$0xff]  ;;  %v603_v22 = vld [vmem:[#allocation12 + $0x8] sm:$0xff]  ;;  %1641 = vmatprep.subr.bf16.mxu0 %v2147_v24  ;;  %1647 = vmatprep.subr.bf16.mxu1 %v2147_v24  ;;  %vm2148_vm1 = vmmov 0  }
  0xf0   : > { %572 = vadd.xlane.f32.xlu0 %v571_v2  ;;  %v587_v5 = vsel %vm537_vm0, %v586_v4, 0.0  ;;  %v1642_v23 = vpack.c.bf16 %v603_v22, %v602_v21  ;;  %v604_v25 = vld [vmem:[#allocation12 + $0x10] sm:$0xff]  ;;  %v605_v26 = vld [vmem:[#allocation12 + $0x18] sm:$0xff]  ;;  %v2149_v28 = vmov 0.0   ;;  %v680_v29 = vld [vmem:[#allocation13] sm:$0xff]  ;;  %vm837_vm2 = vcmask 130048  }
  0xf1   : > { %v1645_v27 = vpack.c.bf16 %v605_v26, %v604_v25  ;;  %1585 = vmatprep.mubr.msk.f32.mxu0 %vm2148_vm1, %v2149_v28  ;;  %1596 = vmatprep.mubr.msk.f32.mxu1 %vm2148_vm1, %v2149_v28  ;;  %v681_v30 = vld [vmem:[#allocation13 + $0x8] sm:$0xff]  ;;  %v682_v31 = vld [vmem:[#allocation13 + $0x10] sm:$0xff]  ;;  %v683_v33 = vld [vmem:[#allocation13 + $0x18] sm:$0xff]  ;;  %vm914_vm3 = vcmask 64512   ;;  %s2150_s3 = smov 112   ;;  %s1527_s22 = sshll.u32 %s2513_s17, 4 }
  0xf2   : > { %1643 = vmatpush3.bf16.msra.mxu0 %v1642_v23  ;;  %v1648_v32 = vpack.c.bf16 %v681_v30, %v680_v29  ;;  %v1651_v34 = vpack.c.bf16 %v683_v33, %v682_v31  ;;  %v2566_v45 = vld [vmem:[%s2725_s7] ss:$0 sm:$0xff]  ;;  %v759_v48 = vld [vmem:[#allocation10 + $0x8] sm:$0xff]  ;;  %v760_v55 = vld [vmem:[#allocation10 + $0x10] sm:$0xff]  ;;  %s2604_s9 = scalar_lea.vmem [#allocation17], %s1527_s22  ;;  %s2151_s13 = smov 16  }
  0xf3   : > { %1644 = vmatprep.subr.bf16.mxu0 %v2147_v24  ;;  %v758_v47 = vld [vmem:[#allocation10] sm:$0xff]  ;;  %v761_v56 = vld [vmem:[#allocation10 + $0x18] sm:$0xff]  ;;  %s2796_s24 = sld [smem:[#allocation26_spill]]  ;;  %s2797_s21 = sld [smem:[#allocation30_spill]] }
  0xf4   : > { %539 = vadd.xlane.f32.xlu0 %v538_v3  ;;  %1649 = vmatpush3.bf16.msra.mxu1 %v1648_v32  ;;  %v2571_v49 = vld [vmem:[%s2726_s8] ss:$0 sm:$0xff]  ;;  %v1654_v52 = vpack.c.bf16 %v759_v48, %v758_v47  ;;  %v1657_v58 = vpack.c.bf16 %v761_v56, %v760_v55  ;;  %v1182_v48 = vld [vmem:[#allocation15 + $0x18] sm:$0xff]  ;;  %s1306_s25 = sshll.u32 %s2604_s9, 4  ;;  %s2798_s1 = sld [smem:[#allocation37_spill]]  ;;  %s2635_s25 = int_to_ptr.vmem [resolvable:$true] %s1306_s25 }
  0xf5   : > { %1650 = vmatprep.subr.bf16.mxu1 %v2147_v24  ;;  %s1278_s23 = scalar_lea.sflag [#allocation18], %s2513_s17  ;;  %s2010_s20 = scalar_lea.vmem %s2635_s25, 256 }
  0xf6   : > { %1646 = vmatpush3.bf16.msra.mxu0 %v1645_v27  ;;  %p2011_p13 = scmp.ne.s32.totalorder %s2635_s25, %s2010_s20  ;;  %s2152_s26 = smov [#allocation17]  }
  0xf7   : > { %1653 = vmatprep.subr.bf16.mxu0 %v2147_v24  ;;  %s2014_s30 = sshll.u32 %s2152_s26, 4  ;;  %s2015_s30 = int_to_ptr.vmem [resolvable:$false] %s2014_s30 }
  0xf8   : > { %588 = vadd.xlane.f32.xlu0 %v587_v5  ;;  %1652 = vmatpush3.bf16.msra.mxu1 %v1651_v34  ;;  %s2016_s18 = scalar_lea.vmem %s2015_s30, 512  ;;  %p2017_p8 = scmp.lt.s32.totalorder %s2635_s25, %s2015_s30 }
  0xf9   : > { %1610 = vmatprep.subr.mxu1 %v2149_v28  ;;  %s1548_s11 = sshll.u32 %s2796_s24, 8  ;;  %p2799_p2 = scmp.ne.s32.totalorder %s2797_s21, 0 }
  0xfa   : > { %s2633_s28 = scalar_lea.hbm %s2798_s1, %s1548_s11  ;;  %p2018_p9 = scmp.lt.s32.totalorder %s2016_s18, %s2010_s20 }
  0xfb   : > { %p2012_p1 = pnand %p2011_p13, %p2799_p2 }
  0xfc   : > { %p2019_p7 = por %p2018_p9, %p2017_p8 }
  0xfd   : > { %p2013_p12 = pneg %p2012_p1 }
  0xff   : > { %p2020_p11 = pnand %p2019_p7, %p2013_p12 }
 0x17d   : > { %v573_v6 = vpop.xlane.xlu0 %572 }
 0x17e   : > { %v574_v7 = vmul.f32 0.03125, %v573_v6 }
 0x180   : > { %v575_v8 = vsub.f32 %v570_v0, %v574_v7 }
 0x181   : > { %v540_v9 = vpop.xlane.xlu0 %539 }
 0x182   : > { %v542_v10 = vmul.f32 0.03125, %v540_v9  ;;  %v576_v11 = vmul.f32 %v575_v8, %v575_v8 }
 0x184   : > { %v543_v12 = vsub.f32 %v2539_v1, %v542_v10  ;;  %v577_v13 = vsel %vm537_vm0, %v576_v11, 0.0 }
 0x185   : > { %578 = vadd.xlane.f32.xlu1 %v577_v13  ;;  %v589_v14 = vpop.xlane.xlu0 %588 }
 0x186   : > { %v544_v15 = vmul.f32 %v543_v12, %v543_v12  ;;  %v590_v16 = vmul.f32 0.03125, %v589_v14 }
 0x188   : > { %v545_v17 = vsel %vm537_vm0, %v544_v15, 0.0  ;;  %v2548_v18 = vsub.f32 %v586_v4, %v590_v16 }
 0x189   : > { %546 = vadd.xlane.f32.xlu1 %v545_v17 }
 0x18a   : > { %v592_v19 = vmul.f32 %v2548_v18, %v2548_v18 }
 0x18c   : > { %v593_v20 = vsel %vm537_vm0, %v592_v19, 0.0 }
 0x18d   : > { %594 = vadd.xlane.f32.xlu1 %v593_v20 }
 0x212   : > { %v579_v35 = vpop.xlane.xlu1 %578 }
 0x213   : > { %v580_v36 = vmul.f32 0.03125, %v579_v35 }
 0x215   : > { %v581_v37 = vadd.f32 1e-06, %v580_v36 }
 0x216   : > { %v547_v38 = vpop.xlane.xlu1 %546 }
 0x217   : > { %1792 = vrsqrt.f32 %v581_v37  ;;  %v548_v39 = vmul.f32 0.03125, %v547_v38 }
 0x219   : > { %v549_v40 = vadd.f32 1e-06, %v548_v39 }
 0x21a   : > { %v595_v41 = vpop.xlane.xlu1 %594 }
 0x21b   : > { %1794 = vrsqrt.f32 %v549_v40  ;;  %v596_v42 = vmul.f32 0.03125, %v595_v41 }
 0x21d   : > { %v597_v43 = vadd.f32 1e-06, %v596_v42 }
 0x21f   : > { %1796 = vrsqrt.f32 %v597_v43  ;;  %v1179_v43 = vld [vmem:[#allocation15] sm:$0xff] }
 0x221   : > { %v1793_v44 = vpop.eup %1792 }
 0x222   : > { %v583_v46 = vmul.f32 %v1793_v44, %v575_v8  ;;  %v1180_v44 = vld [vmem:[#allocation15 + $0x8] sm:$0xff] }
 0x223   : > { %v1660_v47 = vpack.c.bf16 %v1180_v44, %v1179_v43 }
 0x224   : > { %v584_v50 = vmul.f32 %v2566_v45, %v583_v46  ;;  %v1181_v46 = vld [vmem:[#allocation15 + $0x10] sm:$0xff] }
 0x225   : > { %v1795_v51 = vpop.eup %1794 }
 0x226   : > { %v551_v53 = vmul.f32 %v1795_v51, %v543_v12  ;;  %v585_v54 = vadd.f32 %v2571_v49, %v584_v50  ;;  %v1663_v50 = vpack.c.bf16 %v1182_v48, %v1181_v46 }
 0x228   : > { %1586 = vmatmul.mubr.msk.f32.vlgmr.msra.gmra.mrb[0].mxu0 %vm537_vm0, %v585_v54  ;;  %v558_v59 = vmul.f32 %v2566_v45, %v551_v53 }
 0x229   : > { %v1797_v57 = vpop.eup %1796  ;;  %1655 = vmatpush3.bf16.msra.mxu0 %v1654_v52  ;;  %1607 = vmatprep.mubr.msk.f32.mxu0 %vm2148_vm1, %v2149_v28 }
 0x22a   : > { %1656 = vmatprep.subr.bf16.mxu0 %v2147_v24  ;;  %v599_v60 = vmul.f32 %v1797_v57, %v2548_v18  ;;  %v565_v62 = vadd.f32 %v2571_v49, %v558_v59 }
 0x22c   : > { %v600_v61 = vmul.f32 %v2566_v45, %v599_v60 }
 0x22d   : > { %1658 = vmatpush3.bf16.msra.mxu0 %v1657_v58 }
 0x22e   : > { %v601_v63 = vadd.f32 %v2571_v49, %v600_v61  ;;  %1659 = vmatprep.subr.bf16.mxu0 %v2147_v24 }
 0x230   : > { %1608 = vmatmul.mubr.msk.f32.vlgmr.msra.gmra.mrb[2].mxu0 %vm537_vm0, %v565_v62  ;;  %1597 = vmatmul.mubr.msk.f32.vlgmr.msra.gmra.mrb[0].mxu1 %vm537_vm0, %v601_v63 }
 0x231   : > { %1612 = vmatprep.mubr.msk.f32.mxu1 %vm2148_vm1, %v2149_v28  ;;  %1638 = vmatprep.mubr.msk.f32.mxu0 %vm2148_vm1, %v2149_v28 }
 0x232   : > { %1661 = vmatpush3.bf16.msra.mxu0 %v1660_v47 }
 0x233   : > { %1662 = vmatprep.subr.bf16.mxu0 %v2147_v24 }
 0x236   : > { %1664 = vmatpush3.bf16.msra.mxu0 %v1663_v50 }
 0x2fb   : > { %v675_v0 = vpop.f32.mrb[0].mxu0 }
 0x2fc   : > { %679 = vst.msk [vmem:[#allocation2] sm:$0xff] %vm537_vm0, %v675_v0  ;;  %v1587_v2 = vpop.f32.mrb[1].mxu0 }
 0x303   : > { %v831_v3 = vpop.f32.mrb[2].mxu0  ;;  %v835_v4 = vld [vmem:[#allocation2] sm:$0xff]  ;;  %v753_v5 = vpop.f32.mrb[0].mxu1 }
 0x304   : > { %v1609_v6 = vpop.f32.mrb[3].mxu0  ;;  %1611 = vmatpush3.xpose.msk.msra.mxu1 %vm837_vm2, %v835_v4  ;;  %757 = vst.msk [vmem:[#allocation3] sm:$0xff] %vm537_vm0, %v753_v5  ;;  %v1598_v7 = vpop.f32.mrb[1].mxu1 }
 0x305   : > { %1615 = vmatprep.subr.mxu1 %v2149_v28 }
 0x307   : > { %1613 = vmatmul.mubr.msk.f32.vlgmr.msra.gmra.mrb[2].mxu1 %vm837_vm2, %v831_v3 }
 0x308   : > { %1617 = vmatprep.mubr.msk.f32.mxu1 %vm2148_vm1, %v2149_v28 }
 0x30b   : > { %v836_v8 = vld [vmem:[#allocation3] sm:$0xff] }
 0x30c   : > { %1616 = vmatpush3.msra.mxu1 %v836_v8 }
 0x30d   : > { %1620 = vmatprep.subr.mxu1 %v2149_v28 }
 0x3da   : > { %v910_v9 = vpop.f32.mrb[2].mxu1 }
 0x3db   : > { %v1614_v10 = vpop.f32.mrb[3].mxu1  ;;  %v915_v11 = vsel %vm914_vm3, %v910_v9, -inf }
 0x3dc   : > { %916 = vmax.xlane.f32.xlu0 %v915_v11 }
 0x3f2   : > { %1005 = vrot.lane.b32.xlu0 %v835_v4, %s2150_s3 }
 0x469   : > { %v917_v12 = vpop.xlane.xlu0 %916 }
 0x46a   : > { %v918_v13 = vsub.f32 %v910_v9, %v917_v12 }
 0x46c   : > { %v919_v14 = vmul.f32 1.442695, %v918_v13 }
 0x46d   : > { %v1006_v23 = vpop.permute.xlu0 %1005 }
 0x46e   : > { %1798 = vpow2.f32 %v919_v14 }
 0x478   : > { %v1799_v15 = vpop.eup %1798 }
 0x479   : > { %v921_v16 = vsel %vm914_vm3, %v1799_v15, 0.0 }
 0x47a   : > { %922 = vadd.xlane.f32.xlu1 %v921_v16 }
 0x48b   : > { %1003 = vrot.lane.b32.xlu1 %v831_v3, %s2150_s3 }
 0x507   : > { %v923_v17 = vpop.xlane.xlu1 %922 }
 0x508   : > { %1800 = vrcp.f32 %v923_v17 }
 0x50b   : > { %v1004_v25 = vpop.permute.xlu1 %1003 }
 0x512   : > { %v1801_v18 = vpop.eup %1800 }
 0x513   : > { %v925_v19 = vmul.f32 %v1801_v18, %v923_v17 }
 0x515   : > { %v926_v20 = vsub.f32 2.0, %v925_v19 }
 0x517   : > { %v927_v21 = vmul.f32 %v1801_v18, %v926_v20 }
 0x519   : > { %v928_v22 = vmul.f32 %v1799_v15, %v927_v21 }
 0x51b   : > { %929 = vst.msk [vmem:[%s2604_s9] sm:$0xff] %vm914_vm3, %v928_v22  ;;  %1618 = vmatmul.mubr.msk.f32.vlgmr.msra.gmra.mrb[4].mxu1 %vm914_vm3, %v928_v22 }
 0x51c   : > { %1621 = vmatpush3.xpose.msk.msra.mxu1 %vm837_vm2, %v1006_v23  ;;  %1622 = vmatprep.mubr.msk.f32.mxu1 %vm2148_vm1, %v2149_v28 }
 0x51d   : > { %1625 = vmatprep.subr.mxu1 %v2149_v28 }
 0x51f   : > { %1623 = vmatmul.mubr.msk.f32.vlgmr.msra.gmra.mrb[6].mxu1 %vm837_vm2, %v1004_v25 }
 0x520   : > { %1627 = vmatprep.mubr.msk.f32.mxu1 %vm2148_vm1, %v2149_v28 }
 0x5ee   : > { %v999_v26 = vpop.f32.mrb[4].mxu1 }
 0x5ef   : > { %v1619_v27 = vpop.f32.mrb[5].mxu1 }
 0x5f2   : > { %v1077_v29 = vpop.f32.mrb[6].mxu1 }
 0x5f3   : > { %v1624_v30 = vpop.f32.mrb[7].mxu1  ;;  %v1081_v31 = vsel %vm914_vm3, %v1077_v29, -inf }
 0x5f4   : > { %1082 = vmax.xlane.f32.xlu1 %v1081_v31 }
 0x681   : > { %v1083_v32 = vpop.xlane.xlu1 %1082 }
 0x682   : > { %v1084_v33 = vsub.f32 %v1077_v29, %v1083_v32 }
 0x684   : > { %v1085_v34 = vmul.f32 1.442695, %v1084_v33 }
 0x686   : > { %1802 = vpow2.f32 %v1085_v34 }
 0x690   : > { %v1803_v35 = vpop.eup %1802 }
 0x691   : > { %v1087_v36 = vsel %vm914_vm3, %v1803_v35, 0.0 }
 0x692   : > { %1088 = vadd.xlane.f32.xlu0 %v1087_v36 }
 0x6a8   : > { %1098 = vrot.lane.b32.xlu0 %v836_v8, %s2150_s3 }
 0x71f   : > { %v1089_v37 = vpop.xlane.xlu0 %1088 }
 0x720   : > { %1804 = vrcp.f32 %v1089_v37 }
 0x723   : > { %v1099_v28 = vpop.permute.xlu0 %1098 }
 0x724   : > { %1626 = vmatpush3.msra.mxu1 %v1099_v28 }
 0x72a   : > { %v1805_v38 = vpop.eup %1804 }
 0x72b   : > { %v1091_v39 = vmul.f32 %v1805_v38, %v1089_v37 }
 0x72d   : > { %v1092_v40 = vsub.f32 2.0, %v1091_v39 }
 0x72f   : > { %v1093_v41 = vmul.f32 %v1805_v38, %v1092_v40 }
 0x731   : > { %v1094_v42 = vmul.f32 %v1803_v35, %v1093_v41 }
 0x733   : > { %1538 = vst.msk [vmem:[%s2604_s9 + $0x8] sm:$0xff] %vm914_vm3, %v1094_v42  ;;  %1628 = vmatmul.mubr.msk.f32.vlgmr.msra.gmra.mrb[8].mxu1 %vm914_vm3, %v1094_v42 }
 0x806   : > { %v1170_v51 = vpop.f32.mrb[8].mxu1 }
 0x807   : > { %1175 = vrot.lane.b32.xlu1 %v1170_v51, %s2151_s13  ;;  %v1629_v52 = vpop.f32.mrb[9].mxu1 }
 0x879   : > { %v1176_v53 = vpop.permute.xlu1 %1175 }
 0x87a   : > { %v1178_v54 = vsel %vm837_vm2, %v999_v26, %v1176_v53 }
 0x87b   : > { %1639 = vmatmul.mubr.msk.f32.vlgmr.msra.gmra.mrb[4].mxu0 %vm537_vm0, %v1178_v54 }
 0x94e   : > { %v1252_v55 = vpop.f32.mrb[4].mxu0 }
 0x94f   : > { %v1253_v56 = vadd.f32 %v1252_v55, %v2539_v1  ;;  %v1640_v57 = vpop.f32.mrb[5].mxu0 }
 0x951   : > { %v1256_v24 = vsel %vm537_vm0, %v1253_v56, 0.0 }
 0x952   : > { %1257 = vadd.xlane.f32.xlu1 %v1256_v24 }
 0x9df   : > { %v1258_v58 = vpop.xlane.xlu1 %1257 }
 0x9e0   : > { %v1259_v59 = vmul.f32 0.03125, %v1258_v58 }
 0x9e2   : > { %v1260_v60 = vsub.f32 %v1253_v56, %v1259_v59 }
 0x9e4   : > { %v1261_v61 = vmul.f32 %v1260_v60, %v1260_v60 }
 0x9e6   : > { %v1262_v62 = vsel %vm537_vm0, %v1261_v61, 0.0 }
 0x9e7   : > { %1263 = vadd.xlane.f32.xlu0 %v1262_v62 }
 0x9e8   : > { %2023 = shalt.err (!%p2020_p11)
}
 0x9e9   : > { %s2024_s19 = scalar_lea.hbm %s2633_s28, 256  ;;  %s2028_s16 = scalar_lea.hbm %s2798_s1, 512 }
 0x9ea   : > { %p2025_p5 = scmp.ne.s32.totalorder %s2633_s28, %s2024_s19  ;;  %p2029_p0 = scmp.lt.u32.totalorder %s2633_s28, %s2798_s1 }
 0x9eb   : > { %p2030_p4 = scmp.lt.u32.totalorder %s2028_s16, %s2024_s19  ;;  %p2032_p13 = scmp.lt.u32.totalorder %s2024_s19, %s2633_s28 }
 0x9ec   : > { %p2026_p3 = pnand %p2025_p5, %p2799_p2 }
 0x9ed   : > { %p2031_p10 = por %p2030_p4, %p2029_p0 }
 0x9ee   : > { %p2027_p6 = pneg %p2026_p3 }
 0x9ef   : > { %p2033_p1 = por %p2032_p13, %p2031_p10 }
 0x9f1   : > { %p2034_p12 = pnand %p2033_p1, %p2027_p6 }
 0x9f3   : > { %2037 = shalt.err (!%p2034_p12)
}
 0x9f4   : > { %s2153_s9 = smov 128   ;;  %s2154_s13 = smov 8  }
 0x9f5   : > { %1688 = dma.vmem_to_hbm [thread:$0]  (%p2799_p2), %s2635_s25, 256, %s2633_s28, %s1278_s23, %s2153_s9, %s2153_s9, %s2154_s13  }
 0x9f6   : > { %s1543_s11 = sshll.u32 %s2796_s24, 7  ;;  %s526_s5 = scalar_lea.vmem [#allocation16], %s2516_s10 }
 0x9f7   : > { %s1292_s27 = sshll.u32 %s526_s5, 4  ;;  %s2800_s30 = sld [smem:[#allocation36_spill]]  ;;  %s2670_s27 = int_to_ptr.vmem [resolvable:$true] %s1292_s27 }
 0x9f8   : > { %s1273_s25 = scalar_lea.sflag [#allocation6], %s2513_s17  ;;  %s2038_s24 = scalar_lea.vmem %s2670_s27, 128 }
 0x9f9   : > { %p2039_p8 = scmp.ne.s32.totalorder %s2670_s27, %s2038_s24  ;;  %s2155_s10 = smov [#allocation16]  }
 0x9fa   : > { %s2042_s28 = sshll.u32 %s2155_s10, 4  ;;  %s2043_s28 = int_to_ptr.vmem [resolvable:$false] %s2042_s28 }
 0x9fb   : > { %p2040_p9 = pnand %p2039_p8, %p2799_p2  ;;  %s2044_s23 = scalar_lea.vmem %s2043_s28, 256 }
 0x9fc   : > { %p2045_p11 = scmp.lt.s32.totalorder %s2670_s27, %s2043_s28  ;;  %p2046_p5 = scmp.lt.s32.totalorder %s2044_s23, %s2038_s24 }
 0x9fd   : > { %s2668_s18 = scalar_lea.hbm %s2800_s30, %s1543_s11  ;;  %p2041_p7 = pneg %p2040_p9 }
 0x9fe   : > { %p2047_p3 = por %p2046_p5, %p2045_p11 }
 0xa00   : > { %p2048_p6 = pnand %p2047_p3, %p2041_p7 }
 0xa74   : > { %v1264_v1 = vpop.xlane.xlu0 %1263 }
 0xa75   : > { %v1265_v63 = vmul.f32 0.03125, %v1264_v1 }
 0xa77   : > { %v1266_v0 = vadd.f32 1e-06, %v1265_v63 }
 0xa79   : > { %1806 = vrsqrt.f32 %v1266_v0 }
 0xa83   : > { %v1807_v2 = vpop.eup %1806 }
 0xa84   : > { %v1268_v3 = vmul.f32 %v1807_v2, %v1260_v60 }
 0xa86   : > { %v1269_v4 = vmul.f32 %v2566_v45, %v1268_v3 }
 0xa88   : > { %v1270_v5 = vadd.f32 %v2571_v49, %v1269_v4 }
 0xa8a   : > { %1271 = vst.msk [vmem:[%s526_s5] sm:$0xff] %vm537_vm0, %v1270_v5 }
 0xa8b   : > { %2051 = shalt.err (!%p2048_p6)
}
 0xa8c   : > { %s2052_s17 = scalar_lea.hbm %s2668_s18, 128  ;;  %s2056_s29 = scalar_lea.hbm %s2800_s30, 256 }
 0xa8d   : > { %p2053_p0 = scmp.ne.s32.totalorder %s2668_s18, %s2052_s17  ;;  %p2057_p13 = scmp.lt.u32.totalorder %s2668_s18, %s2800_s30 }
 0xa8e   : > { %p2058_p1 = scmp.lt.u32.totalorder %s2056_s29, %s2052_s17  ;;  %p2060_p8 = scmp.lt.u32.totalorder %s2052_s17, %s2668_s18 }
 0xa8f   : > { %p2054_p4 = pnand %p2053_p0, %p2799_p2 }
 0xa90   : > { %p2059_p12 = por %p2058_p1, %p2057_p13 }
 0xa91   : > { %p2055_p10 = pneg %p2054_p4 }
 0xa92   : > { %p2061_p9 = por %p2060_p8, %p2059_p12 }
 0xa94   : > { %p2062_p7 = pnand %p2061_p9, %p2055_p10 }
 0xa96   : > { %2065 = shalt.err (!%p2062_p7)
}
 0xa97   : > { %1687 = dma.vmem_to_hbm [thread:$0]  (%p2799_p2), %s2670_s27, 128, %s2668_s18, %s1273_s25  }
 0xa98 PF: > { %s2801_s22 = sld [smem:[#allocation25_spill]]  ;;  %s2802_s9 = sld [smem:[#allocation32_spill]] }
 0xa99   : > { %s2803_s13 = sld [smem:[#allocation28_spill]] }
 0xa9e   : > { %s1321_s11 = sand.u32 1, %s2801_s22   ;;  %p2804_p11 = scmp.ne.s32.totalorder %s2802_s9, 0 }
 0xa9f   : > { %p2805_p5 = scmp.ge.s32.totalorder %s2803_s13, 2  ;;  %s1322_s5 = scalar_lea.sflag [#allocation6], %s1321_s11 }
 0xaa1   : > { %p1715_p3 = pnand %p2805_p5, %p2804_p11 }
 0xaa3   : > { %2107 = dma.done.wait (!%p1715_p3), %s1322_s5, 128  }
 0xaa4   : > { %2109 = vsyncadd (!%p1715_p3), %s1322_s5, 4294967168  ;;  %s1331_s20 = scalar_lea.sflag [#allocation18], %s1321_s11 }
 0xaa5   : > { %2111 = dma.done.wait (!%p1715_p3), %s1331_s20, 256  }
 0xaa6   : > { %2113 = vsyncadd (!%p1715_p3), %s1331_s20, 4294967040  ;;  %s35_s18 = sadd.s32 1, %s2803_s13   ;;  %s2806_s21 = sld [smem:[#allocation31_spill]] }
 0xaa7   : > { %p32_p6 = scmp.ge.s32.totalorder %s35_s18, 4   ;;  %s2807_s16 = sld [smem:[#allocation27_spill]] }
 0xaa8   : > { %s2808_s17 = sld [smem:[#allocation29_spill]]  ;;  %s2809_s13 = smov %s2120_s14 }
 0xaa9   : > { %s2810_s14 = smov %s2124_s15  ;;  %34 = sbr.rel (!%p32_p6) target bundleno = 18 (0x12), region = 163 }
 0xaac   : > { %s2811_s15 = smov %s2806_s21 }
 0xab0   :  { %1336 = vsyncpa [#allocation5], 1 }
 0xab1   :  { %1338 = vsyncpa [#allocation5 + $0x1], 1 }
 0xab2   :  { %1339 = vsyncpa [#allocation8], 1 }
 0xab3   :  { %1341 = vsyncpa [#allocation8 + $0x1], 1 }
 0xab4   :  { %1342 = vsyncpa [#allocation11], 1 }
 0xab5   :  { %1343 = vsyncpa [#allocation14], 1 }
 0xab6   :  { %1344 = vsyncpa [#allocation6], 1 }
 0xab7   :  { %1346 = vsyncpa [#allocation6 + $0x1], 1 }
 0xab8   :  { %1347 = vsyncpa [#allocation18], 1 }
 0xab9   :  { %1349 = vsyncpa [#allocation18 + $0x1], 1 }

</bundles_post_ra>
